<compile_context>
chip_gen: v7x
topology: tpu7x:2x2x1
jax: 0.10.0
libtpu: 0.0.40
codegen_flags: <defaults>
</compile_context>

<pallas_src>
import functools
import math

import jax
import jax.numpy as jnp
from jax.experimental import pallas as pl
from jax.experimental.pallas import tpu as pltpu

# Set True on v5e to move the softmax divides onto the EUP slot (vrcp).
APPROX_RECIPROCAL = False
# Finite "-inf" so fully-masked rows stay NaN-free (exp underflows to exactly 0).
_NEG_BIG = -1e9


def _pick_tile(n, target, quantum):
    """Largest t <= target with t % quantum == 0 and n % t == 0, else n (full dim)."""
    t = min(target, n)
    t -= t % quantum
    while t >= quantum:
        if n % t == 0:
            return t
        t -= quantum
    return n


# ----------------------------------------------------------------------------
# Fused residual-add + LayerNorm  (and standalone LayerNorm for pre-norm)
# ----------------------------------------------------------------------------
def _residual_ln_kernel(x_ref, r_ref, g_ref, b_ref, o_ref, *, eps, apply_ln):
    y = x_ref[...].astype(jnp.float32) + r_ref[...].astype(jnp.float32)
    if apply_ln:
        mean = jnp.mean(y, axis=-1, keepdims=True)
        var = jnp.mean((y - mean) ** 2, axis=-1, keepdims=True)
        y = (y - mean) * jax.lax.rsqrt(var + eps) * g_ref[...] + b_ref[...]
    o_ref[...] = y.astype(o_ref.dtype)


def residual_layernorm(x2d, r2d, gamma, beta, apply_ln=True, eps=1e-5, tm_target=512):
    n, d = x2d.shape
    tm = _pick_tile(n, tm_target, 8)
    return pl.pallas_call(
        functools.partial(_residual_ln_kernel, eps=eps, apply_ln=apply_ln),
        out_shape=jax.ShapeDtypeStruct((n, d), x2d.dtype),
        grid_spec=pltpu.PrefetchScalarGridSpec(
            num_scalar_prefetch=0,
            grid=(n // tm,),
            in_specs=[
                pl.BlockSpec((tm, d), lambda i: (i, 0)),
                pl.BlockSpec((tm, d), lambda i: (i, 0)),
                pl.BlockSpec((1, d), lambda i: (0, 0)),
                pl.BlockSpec((1, d), lambda i: (0, 0)),
            ],
            out_specs=pl.BlockSpec((tm, d), lambda i: (i, 0)),
        ),
        compiler_params=pltpu.CompilerParams(dimension_semantics=("parallel",)),
    )(x2d, r2d, gamma.reshape(1, -1), beta.reshape(1, -1))


def _ln_kernel(x_ref, g_ref, b_ref, o_ref, *, eps):
    x = x_ref[...].astype(jnp.float32)
    mean = jnp.mean(x, axis=-1, keepdims=True)
    var = jnp.mean((x - mean) ** 2, axis=-1, keepdims=True)
    y = (x - mean) * jax.lax.rsqrt(var + eps) * g_ref[...] + b_ref[...]
    o_ref[...] = y.astype(o_ref.dtype)


def layernorm(x2d, gamma, beta, eps=1e-5, tm_target=512):
    n, d = x2d.shape
    tm = _pick_tile(n, tm_target, 8)
    return pl.pallas_call(
        functools.partial(_ln_kernel, eps=eps),
        out_shape=jax.ShapeDtypeStruct((n, d), x2d.dtype),
        grid_spec=pltpu.PrefetchScalarGridSpec(
            num_scalar_prefetch=0,
            grid=(n // tm,),
            in_specs=[
                pl.BlockSpec((tm, d), lambda i: (i, 0)),
                pl.BlockSpec((1, d), lambda i: (0, 0)),
                pl.BlockSpec((1, d), lambda i: (0, 0)),
            ],
            out_specs=pl.BlockSpec((tm, d), lambda i: (i, 0)),
        ),
        compiler_params=pltpu.CompilerParams(dimension_semantics=("parallel",)),
    )(x2d, gamma.reshape(1, -1), beta.reshape(1, -1))


# ----------------------------------------------------------------------------
# Row-tiled Linear (used for the fused QKV / Q / KV / output projections)
# ----------------------------------------------------------------------------
def _linear_kernel(x_ref, w_ref, b_ref, o_ref, *, activation):
    y = jnp.dot(x_ref[...], w_ref[...], preferred_element_type=jnp.float32)
    y = y + b_ref[...]
    if activation == "relu":
        y = jnp.maximum(y, 0.0)
    o_ref[...] = y.astype(o_ref.dtype)


def linear(x2d, w, b, activation=None, tm_target=256):
    # w: (din, dout).  Weight kept resident, rows streamed in (tm, din) tiles.
    # TODO(synk): add K/N weight tiling (and bf16 weight cast) for very large
    # din/dout so the resident block stays within the v7x 64 MiB VMEM budget.
    n, din = x2d.shape
    dout = w.shape[1]
    tm = _pick_tile(n, tm_target, 8)
    return pl.pallas_call(
        functools.partial(_linear_kernel, activation=activation),
        out_shape=jax.ShapeDtypeStruct((n, dout), x2d.dtype),
        grid_spec=pltpu.PrefetchScalarGridSpec(
            num_scalar_prefetch=0,
            grid=(n // tm,),
            in_specs=[
                pl.BlockSpec((tm, din), lambda i: (i, 0)),
                pl.BlockSpec((din, dout), lambda i: (0, 0)),
                pl.BlockSpec((1, dout), lambda i: (0, 0)),
            ],
            out_specs=pl.BlockSpec((tm, dout), lambda i: (i, 0)),
        ),
        compiler_params=pltpu.CompilerParams(dimension_semantics=("parallel",)),
    )(x2d, w, b.reshape(1, -1))


# ----------------------------------------------------------------------------
# Fused FFN: fc1 + ReLU + fc2 + residual (+ post-LN), hidden kept in VMEM
# ----------------------------------------------------------------------------
def _ffn_kernel(x_ref, w1_ref, b1_ref, w2_ref, b2_ref, r_ref, g_ref, be_ref,
                o_ref, acc_ref, *, eps, apply_ln):
    fi = pl.program_id(1)

    @pl.when(fi == 0)
    def _():
        acc_ref[...] = jnp.zeros(acc_ref.shape, jnp.float32)

    h = jnp.dot(x_ref[...], w1_ref[...], preferred_element_type=jnp.float32)
    h = jnp.maximum(h + b1_ref[...], 0.0)
    acc_ref[...] += jnp.dot(h, w2_ref[...], preferred_element_type=jnp.float32)

    @pl.when(fi == pl.num_programs(1) - 1)
    def _():
        y = acc_ref[...] + b2_ref[...] + r_ref[...].astype(jnp.float32)
        if apply_ln:
            mean = jnp.mean(y, axis=-1, keepdims=True)
            var = jnp.mean((y - mean) ** 2, axis=-1, keepdims=True)
            y = (y - mean) * jax.lax.rsqrt(var + eps) * g_ref[...] + be_ref[...]
        o_ref[...] = y.astype(o_ref.dtype)


def ffn_block(x2d, r2d, w1, b1, w2, b2, gamma, beta, apply_ln=True, eps=1e-5,
              tm_target=256, tf_target=512):
    n, e = x2d.shape
    f = w1.shape[1]
    tm = _pick_tile(n, tm_target, 8)
    tf = _pick_tile(f, tf_target, 128)
    return pl.pallas_call(
        functools.partial(_ffn_kernel, eps=eps, apply_ln=apply_ln),
        out_shape=jax.ShapeDtypeStruct((n, e), x2d.dtype),
        grid_spec=pltpu.PrefetchScalarGridSpec(
            num_scalar_prefetch=0,
            grid=(n // tm, f // tf),
            in_specs=[
                pl.BlockSpec((tm, e), lambda i, j: (i, 0)),
                pl.BlockSpec((e, tf), lambda i, j: (0, j)),
                pl.BlockSpec((1, tf), lambda i, j: (0, j)),
                pl.BlockSpec((tf, e), lambda i, j: (j, 0)),
                pl.BlockSpec((1, e), lambda i, j: (0, 0)),
                pl.BlockSpec((tm, e), lambda i, j: (i, 0)),
                pl.BlockSpec((1, e), lambda i, j: (0, 0)),
                pl.BlockSpec((1, e), lambda i, j: (0, 0)),
            ],
            out_specs=pl.BlockSpec((tm, e), lambda i, j: (i, 0)),
            scratch_shapes=[pltpu.VMEM((tm, e), jnp.float32)],
        ),
        compiler_params=pltpu.CompilerParams(
            dimension_semantics=("parallel", "arbitrary")),
    )(x2d, w1, b1.reshape(1, -1), w2, b2.reshape(1, -1), r2d,
      gamma.reshape(1, -1), beta.reshape(1, -1))


# ----------------------------------------------------------------------------
# Flash-style self-attention (no probability output), mask built in-kernel
# ----------------------------------------------------------------------------
def _flash_attn_kernel(q_ref, k_ref, v_ref, am_ref, kp_ref, o_ref,
                       m_sc, l_sc, acc_sc, *, scale):
    si = pl.program_id(2)

    @pl.when(si == 0)
    def _():
        m_sc[...] = jnp.full(m_sc.shape, -1e30, jnp.float32)
        l_sc[...] = jnp.zeros(l_sc.shape, jnp.float32)
        acc_sc[...] = jnp.zeros(acc_sc.shape, jnp.float32)

    q = q_ref[0].astype(jnp.float32) * scale          # (H, tq, hd)
    k = k_ref[0].astype(jnp.float32)                  # (H, ts, hd)
    v = v_ref[0].astype(jnp.float32)

    s = jnp.einsum("hqd,hkd->hqk", q, k, preferred_element_type=jnp.float32)
    # additive mask: (tq, ts) attn mask + (1, ts) key-padding bias, clamped finite
    mask = jnp.maximum(am_ref[...] + kp_ref[0], _NEG_BIG)
    s = s + mask[None, :, :]

    m_new = jnp.maximum(m_sc[...], jnp.max(s, axis=-1, keepdims=True))
    alpha = jnp.exp(m_sc[...] - m_new)
    p = jnp.exp(s - m_new)
    l_sc[...] = alpha * l_sc[...] + jnp.sum(p, axis=-1, keepdims=True)
    acc_sc[...] = alpha * acc_sc[...] + jnp.einsum(
        "hqk,hkd->hqd", p, v, preferred_element_type=jnp.float32)
    m_sc[...] = m_new

    @pl.when(si == pl.num_programs(2) - 1)
    def _():
        o = acc_sc[...] * pl.reciprocal(l_sc[...], approx=APPROX_RECIPROCAL)
        o_ref[0] = o.astype(o_ref.dtype)


def flash_self_attention(q, k, v, attn_mask, key_pad_bias, scale,
                         tq_target=128, ts_target=512):
    # q/k/v: (B, H, T|S, hd); attn_mask: (T, S) additive; key_pad_bias: (B, 1, S)
    b, h, t, hd = q.shape
    s = k.shape[2]
    tq = _pick_tile(t, tq_target, 8)
    ts = _pick_tile(s, ts_target, 128)
    return pl.pallas_call(
        functools.partial(_flash_attn_kernel, scale=scale),
        out_shape=jax.ShapeDtypeStruct((b, h, t, hd), q.dtype),
        grid_spec=pltpu.PrefetchScalarGridSpec(
            num_scalar_prefetch=0,
            grid=(b, t // tq, s // ts),
            in_specs=[
                pl.BlockSpec((1, h, tq, hd), lambda bi, qi, si: (bi, 0, qi, 0)),
                pl.BlockSpec((1, h, ts, hd), lambda bi, qi, si: (bi, 0, si, 0)),
                pl.BlockSpec((1, h, ts, hd), lambda bi, qi, si: (bi, 0, si, 0)),
                pl.BlockSpec((tq, ts), lambda bi, qi, si: (qi, si)),
                pl.BlockSpec((1, 1, ts), lambda bi, qi, si: (bi, 0, si)),
            ],
            out_specs=pl.BlockSpec((1, h, tq, hd), lambda bi, qi, si: (bi, 0, qi, 0)),
            scratch_shapes=[
                pltpu.VMEM((h, tq, 1), jnp.float32),
                pltpu.VMEM((h, tq, 1), jnp.float32),
                pltpu.VMEM((h, tq, hd), jnp.float32),
            ],
        ),
        compiler_params=pltpu.CompilerParams(
            dimension_semantics=("parallel", "parallel", "arbitrary")),
    )(q, k, v, attn_mask, key_pad_bias)


# ----------------------------------------------------------------------------
# Encoder attention with head-summed weights output (B, T, S)
# ----------------------------------------------------------------------------
def _attn_weights_kernel(q_ref, k_ref, v_ref, kp_ref, o_ref, p_ref, *, scale):
    q = q_ref[0].astype(jnp.float32) * scale          # (H, tq, hd)
    k = k_ref[0].astype(jnp.float32)                  # (H, S, hd)
    v = v_ref[0].astype(jnp.float32)
    sc = jnp.einsum("hqd,hkd->hqk", q, k, preferred_element_type=jnp.float32)
    sc = sc + kp_ref[0][None, :, :]                   # (H, tq, S) + (1, 1, S)
    mx = jnp.max(sc, axis=-1, keepdims=True)
    e = jnp.exp(sc - mx)
    denom = jnp.sum(e, axis=-1, keepdims=True)
    p = e * pl.reciprocal(denom, approx=APPROX_RECIPROCAL)
    o = jnp.einsum("hqk,hkd->hqd", p, v, preferred_element_type=jnp.float32)
    o_ref[0] = o.astype(o_ref.dtype)
    p_ref[0] = (jnp.sum(p, axis=0) * (1.0 / p.shape[0])).astype(p_ref.dtype)


def attention_with_weights(q, k, v, key_pad_bias, scale, tq_target=128):
    # TODO(synk): K/V kept full-length per block; for very long encoder outputs a
    # two-pass flash variant would be needed to also emit the (B,T,S) weights.
    b, h, t, hd = q.shape
    s = k.shape[2]
    tq = _pick_tile(t, tq_target, 8)
    return pl.pallas_call(
        functools.partial(_attn_weights_kernel, scale=scale),
        out_shape=(jax.ShapeDtypeStruct((b, h, t, hd), q.dtype),
                   jax.ShapeDtypeStruct((b, t, s), jnp.float32)),
        grid_spec=pltpu.PrefetchScalarGridSpec(
            num_scalar_prefetch=0,
            grid=(b, t // tq),
            in_specs=[
                pl.BlockSpec((1, h, tq, hd), lambda bi, qi: (bi, 0, qi, 0)),
                pl.BlockSpec((1, h, s, hd), lambda bi, qi: (bi, 0, 0, 0)),
                pl.BlockSpec((1, h, s, hd), lambda bi, qi: (bi, 0, 0, 0)),
                pl.BlockSpec((1, 1, s), lambda bi, qi: (bi, 0, 0)),
            ],
            out_specs=(
                pl.BlockSpec((1, h, tq, hd), lambda bi, qi: (bi, 0, qi, 0)),
                pl.BlockSpec((1, tq, s), lambda bi, qi: (bi, qi, 0)),
            ),
        ),
        compiler_params=pltpu.CompilerParams(
            dimension_semantics=("parallel", "parallel")),
    )(q, k, v, key_pad_bias)


# ----------------------------------------------------------------------------
# Multihead attention wrappers (fairseq semantics)
# ----------------------------------------------------------------------------
def _padding_bias(mask, batch, src_len):
    if mask is None:
        return jnp.zeros((batch, 1, src_len), jnp.float32)
    return jnp.where(mask.astype(bool), _NEG_BIG, 0.0).astype(
        jnp.float32).reshape(batch, 1, src_len)


def self_attention(x, p, num_heads, attn_mask, key_padding_mask):
    t, b, e = x.shape
    hd = e // num_heads
    scale = hd ** -0.5
    # Fused QKV projection: one matmul / one DMA of x; scaling applied in-kernel.
    qkv = linear(x.reshape(t * b, e), p["w_qkv"], p["b_qkv"])
    qkv = qkv.reshape(t, b, 3, num_heads, hd)
    # TODO(synk): fold these head-split transposes into the attention BlockSpecs.
    q = jnp.transpose(qkv[:, :, 0], (1, 2, 0, 3))     # (B, H, T, hd)
    k = jnp.transpose(qkv[:, :, 1], (1, 2, 0, 3))
    v = jnp.transpose(qkv[:, :, 2], (1, 2, 0, 3))
    am = (attn_mask if attn_mask is not None
          else jnp.zeros((t, t), jnp.float32)).astype(jnp.float32)
    kp = _padding_bias(key_padding_mask, b, t)
    ctx = flash_self_attention(q, k, v, am, kp, scale)
    ctx = jnp.transpose(ctx, (2, 0, 1, 3)).reshape(t * b, e)
    return linear(ctx, p["wo"], p["bo"]).reshape(t, b, e)


def encoder_attention(x, enc, p, num_heads, key_padding_mask):
    t, b, e = x.shape
    s = enc.shape[0]
    hd = e // num_heads
    scale = hd ** -0.5
    q = linear(x.reshape(t * b, e), p["wq"], p["bq"])
    kv = linear(enc.reshape(s * b, e), p["w_kv"], p["b_kv"])   # fused K|V
    q = jnp.transpose(q.reshape(t, b, num_heads, hd), (1, 2, 0, 3))
    kv = kv.reshape(s, b, 2, num_heads, hd)
    k = jnp.transpose(kv[:, :, 0], (1, 2, 0, 3))
    v = jnp.transpose(kv[:, :, 1], (1, 2, 0, 3))
    kp = _padding_bias(key_padding_mask, b, s)
    ctx, probs = attention_with_weights(q, k, v, kp, scale)
    ctx = jnp.transpose(ctx, (2, 0, 1, 3)).reshape(t * b, e)
    out = linear(ctx, p["wo"], p["bo"]).reshape(t, b, e)
    return out, probs


# ----------------------------------------------------------------------------
# TransformerDecoderLayer forward
# ----------------------------------------------------------------------------
def transformer_decoder_layer(params, x, encoder_out, encoder_padding_mask,
                              self_attn_mask=None, self_attn_padding_mask=None,
                              num_heads=4, normalize_before=False):
    # TODO(synk): dropout is identity in eval mode; training dropout, incremental
    # decoding (prev_*_attn_state) and ONNX-trace state are not implemented.
    t, b, e = x.shape

    # --- self-attention block ---
    residual = x
    h = x
    if normalize_before:
        h = layernorm(h.reshape(t * b, e), params["self_attn_ln"]["g"],
                      params["self_attn_ln"]["b"]).reshape(t, b, e)
    h = self_attention(h, params["self_attn"], num_heads,
                       self_attn_mask, self_attn_padding_mask)
    x = residual_layernorm(h.reshape(t * b, e), residual.reshape(t * b, e),
                           params["self_attn_ln"]["g"], params["self_attn_ln"]["b"],
                           apply_ln=not normalize_before).reshape(t, b, e)

    # --- encoder attention block ---
    residual = x
    h = x
    if normalize_before:
        h = layernorm(h.reshape(t * b, e), params["enc_attn_ln"]["g"],
                      params["enc_attn_ln"]["b"]).reshape(t, b, e)
    h, attn = encoder_attention(h, encoder_out, params["enc_attn"], num_heads,
                                encoder_padding_mask)
    x = residual_layernorm(h.reshape(t * b, e), residual.reshape(t * b, e),
                           params["enc_attn_ln"]["g"], params["enc_attn_ln"]["b"],
                           apply_ln=not normalize_before).reshape(t, b, e)

    # --- FFN block (fc1 + relu + fc2 + residual [+ LN], single fused kernel) ---
    residual = x
    h = x
    if normalize_before:
        h = layernorm(h.reshape(t * b, e), params["final_ln"]["g"],
                      params["final_ln"]["b"]).reshape(t, b, e)
    x = ffn_block(h.reshape(t * b, e), residual.reshape(t * b, e),
                  params["fc1_w"], params["fc1_b"],
                  params["fc2_w"], params["fc2_b"],
                  params["final_ln"]["g"], params["final_ln"]["b"],
                  apply_ln=not normalize_before).reshape(t, b, e)
    return x, attn


# ----------------------------------------------------------------------------
# Deterministic parameter init (xavier_uniform weights, zero biases)
# ----------------------------------------------------------------------------
def _xavier(key, fan_in, fan_out):
    limit = math.sqrt(6.0 / (fan_in + fan_out))
    # torch layout (out, in); stored transposed as (in, out) for y = x @ W
    return jax.random.uniform(key, (fan_out, fan_in), jnp.float32, -limit, limit).T


def make_params(key, embed_dim, ffn_dim):
    keys = jax.random.split(key, 6)
    e = embed_dim
    zeros_e = jnp.zeros((e,), jnp.float32)

    def in_proj(k):
        # fairseq: one (3E, E) in_proj_weight initialized with xavier_uniform.
        limit = math.sqrt(6.0 / (3 * e + e))
        w = jax.random.uniform(k, (3 * e, e), jnp.float32, -limit, limit)
        return w.T  # (E, 3E), columns ordered [q | k | v]

    w_self = in_proj(keys[0])
    w_enc = in_proj(keys[2])
    return {
        "self_attn": {"w_qkv": w_self, "b_qkv": jnp.zeros((3 * e,), jnp.float32),
                      "wo": _xavier(keys[1], e, e), "bo": zeros_e},
        "enc_attn": {"wq": w_enc[:, :e], "bq": zeros_e,
                     "w_kv": w_enc[:, e:], "b_kv": jnp.zeros((2 * e,), jnp.float32),
                     "wo": _xavier(keys[3], e, e), "bo": zeros_e},
        "self_attn_ln": {"g": jnp.ones((e,), jnp.float32), "b": zeros_e},
        "enc_attn_ln": {"g": jnp.ones((e,), jnp.float32), "b": zeros_e},
        "final_ln": {"g": jnp.ones((e,), jnp.float32), "b": zeros_e},
        "fc1_w": _xavier(keys[4], e, ffn_dim),
        "fc1_b": jnp.zeros((ffn_dim,), jnp.float32),
        "fc2_w": _xavier(keys[5], ffn_dim, e),
        "fc2_b": zeros_e,
    }


# ----------------------------------------------------------------------------
# Pure-JAX reference (for correctness check)
# ----------------------------------------------------------------------------
def _ref_ln(x, g, b, eps=1e-5):
    m = x.mean(-1, keepdims=True)
    v = ((x - m) ** 2).mean(-1, keepdims=True)
    return (x - m) / jnp.sqrt(v + eps) * g + b


def _ref_self_attn(x, p, num_heads, attn_mask):
    t, b, e = x.shape
    hd = e // num_heads
    qkv = x.reshape(t * b, e) @ p["w_qkv"] + p["b_qkv"]
    q, k, v = jnp.split(qkv, 3, axis=-1)
    q = q * hd ** -0.5
    q = q.reshape(t, b * num_heads, hd).transpose(1, 0, 2)
    k = k.reshape(t, b * num_heads, hd).transpose(1, 0, 2)
    v = v.reshape(t, b * num_heads, hd).transpose(1, 0, 2)
    sc = jnp.einsum("bqd,bkd->bqk", q, k)
    if attn_mask is not None:
        sc = sc + attn_mask[None]
    pr = jax.nn.softmax(sc, axis=-1)
    o = jnp.einsum("bqk,bkd->bqd", pr, v).transpose(1, 0, 2).reshape(t * b, e)
    return (o @ p["wo"] + p["bo"]).reshape(t, b, e)


def _ref_enc_attn(x, enc, p, num_heads, pad_mask):
    t, b, e = x.shape
    s = enc.shape[0]
    hd = e // num_heads
    q = (x.reshape(t * b, e) @ p["wq"] + p["bq"]) * hd ** -0.5
    kv = enc.reshape(s * b, e) @ p["w_kv"] + p["b_kv"]
    k, v = jnp.split(kv, 2, axis=-1)
    q = q.reshape(t, b * num_heads, hd).transpose(1, 0, 2)
    k = k.reshape(s, b * num_heads, hd).transpose(1, 0, 2)
    v = v.reshape(s, b * num_heads, hd).transpose(1, 0, 2)
    sc = jnp.einsum("bqd,bkd->bqk", q, k)
    kp = jnp.broadcast_to(pad_mask.astype(bool)[:, None, None, :],
                          (b, num_heads, t, s)).reshape(b * num_heads, t, s)
    sc = jnp.where(kp, -jnp.inf, sc)
    pr = jax.nn.softmax(sc, axis=-1)
    o = jnp.einsum("bqk,bkd->bqd", pr, v).transpose(1, 0, 2).reshape(t * b, e)
    o = (o @ p["wo"] + p["bo"]).reshape(t, b, e)
    attn = pr.reshape(b, num_heads, t, s).sum(1) / num_heads
    return o, attn


def _ref_layer(params, x, enc, enc_pad, sa_mask, num_heads):
    def ln(lp, h):
        t, b, e = h.shape
        return _ref_ln(h.reshape(t * b, e), lp["g"], lp["b"]).reshape(t, b, e)

    r = x
    h = _ref_self_attn(x, params["self_attn"], num_heads, sa_mask)
    x = ln(params["self_attn_ln"], r + h)
    r = x
    h, attn = _ref_enc_attn(x, enc, params["enc_attn"], num_heads, enc_pad)
    x = ln(params["enc_attn_ln"], r + h)
    r = x
    t, b, e = x.shape
    hid = jnp.maximum(x.reshape(t * b, e) @ params["fc1_w"] + params["fc1_b"], 0.0)
    hid = hid @ params["fc2_w"] + params["fc2_b"]
    x = ln(params["final_ln"], r + hid.reshape(t, b, e))
    return x, attn


# ----------------------------------------------------------------------------
if __name__ == "__main__":
    TGT, SRC, BATCH, EMBED, HEADS, FFN = 8, 10, 2, 32, 4, 64

    key = jax.random.PRNGKey(0)
    kx, kenc, kparams = jax.random.split(key, 3)

    x = jax.random.normal(kx, (TGT, BATCH, EMBED), jnp.float32)
    encoder_out = jax.random.normal(kenc, (SRC, BATCH, EMBED), jnp.float32)

    # encoder padding mask: (batch, src_len), 1 = pad
    encoder_padding_mask = jnp.zeros((BATCH, SRC), jnp.int32).at[1, 8:].set(1)

    # causal self-attention mask (future positions = -inf)
    self_attn_mask = jnp.where(jnp.triu(jnp.ones((TGT, TGT), bool), k=1),
                               -jnp.inf, 0.0).astype(jnp.float32)

    params = make_params(kparams, EMBED, FFN)

    layer = jax.jit(functools.partial(transformer_decoder_layer,
                                      num_heads=HEADS, normalize_before=False))
    out, attn = layer(params, x, encoder_out, encoder_padding_mask,
                      self_attn_mask=self_attn_mask, self_attn_padding_mask=None)
    out = jax.block_until_ready(out)
    attn = jax.block_until_ready(attn)

    ref_out, ref_attn = _ref_layer(params, x, encoder_out, encoder_padding_mask,
                                   self_attn_mask, HEADS)
    assert out.shape == (TGT, BATCH, EMBED) and attn.shape == (BATCH, TGT, SRC)
    assert bool(jnp.allclose(out, ref_out, atol=2e-3, rtol=2e-3)), "output mismatch"
    assert bool(jnp.allclose(attn, ref_attn, atol=2e-3, rtol=2e-3)), "attn mismatch"

    print("KERNEL_OK")
</pallas_src>

<mosaic_0001>
module attributes {stable_mosaic.version = 11 : i64} {
  func.func @_linear_kernel(%arg0: i32, %arg1: memref<16x32xf32, #tpu.memory_space<vmem>>, %arg2: memref<32x96xf32, #tpu.memory_space<vmem>>, %arg3: memref<1x96xf32, #tpu.memory_space<vmem>>, %arg4: memref<16x96xf32, #tpu.memory_space<vmem>>) attributes {dimension_semantics = [#tpu.dimension_semantics<parallel>], iteration_bounds = array<i64: 1>, scalar_prefetch = 0 : i64, scratch_operands = 0 : i64, tpu.core_type = #tpu.core_type<tc>, window_params = [{transform_indices = @transform_0, window_bounds = array<i64: 16, 32>}, {pipeline_mode = #tpu.pipeline_mode<synchronous>, transform_indices = @transform_1, window_bounds = array<i64: 32, 96>}, {pipeline_mode = #tpu.pipeline_mode<synchronous>, transform_indices = @transform_2, window_bounds = array<i64: 1, 96>}, {transform_indices = @transform_3, window_bounds = array<i64: 16, 96>}]} {
    %c0 = arith.constant 0 : index
    %c0_0 = arith.constant 0 : index
    %0 = vector.load %arg1[%c0, %c0_0] : memref<16x32xf32, #tpu.memory_space<vmem>>, vector<16x32xf32>
    %c0_1 = arith.constant 0 : index
    %c0_2 = arith.constant 0 : index
    %1 = vector.load %arg2[%c0_1, %c0_2] : memref<32x96xf32, #tpu.memory_space<vmem>>, vector<32x96xf32>
    %cst = arith.constant dense<0.000000e+00> : vector<16x96xf32>
    %2 = tpu.matmul %0, %1, %cst {dimension_numbers = #tpu.dot_dimension_numbers<[1], [0], [0], [1], [0, 0, 1, 1], [], []>} : vector<16x32xf32>, vector<32x96xf32>, vector<16x96xf32> -> vector<16x96xf32>
    %c0_3 = arith.constant 0 : index
    %c0_4 = arith.constant 0 : index
    %3 = vector.load %arg3[%c0_3, %c0_4] : memref<1x96xf32, #tpu.memory_space<vmem>>, vector<1x96xf32>
    %4 = vector.broadcast %3 : vector<1x96xf32> to vector<16x96xf32>
    %5 = arith.addf %2, %4 : vector<16x96xf32>
    %c0_5 = arith.constant 0 : index
    %c0_6 = arith.constant 0 : index
    %6 = vector.load %arg4[%c0_5, %c0_6] : memref<16x96xf32, #tpu.memory_space<vmem>>, vector<16x96xf32>
    tpu.vector_store %arg4[%c0_5, %c0_6], %5 {strides = array<i32>} : memref<16x96xf32, #tpu.memory_space<vmem>>, vector<16x96xf32>,
    return
  }
  func.func @transform_0(%arg0: i32) -> (i32, i32) {
    %c0_i32 = arith.constant 0 : i32
    %c0_i32_0 = arith.constant 0 : i32
    return %arg0, %c0_i32 : i32, i32
  }
  func.func @transform_1(%arg0: i32) -> (i32, i32) {
    %c0_i32 = arith.constant 0 : i32
    %c0_i32_0 = arith.constant 0 : i32
    %c0_i32_1 = arith.constant 0 : i32
    return %c0_i32, %c0_i32_0 : i32, i32
  }
  func.func @transform_2(%arg0: i32) -> (i32, i32) {
    %c0_i32 = arith.constant 0 : i32
    %c0_i32_0 = arith.constant 0 : i32
    %c0_i32_1 = arith.constant 0 : i32
    return %c0_i32, %c0_i32_0 : i32, i32
  }
  func.func @transform_3(%arg0: i32) -> (i32, i32) {
    %c0_i32 = arith.constant 0 : i32
    %c0_i32_0 = arith.constant 0 : i32
    return %arg0, %c0_i32 : i32, i32
  }
}

module attributes {stable_mosaic.version = 11 : i64} {
  func.func @_flash_attn_kernel(%arg0: i32, %arg1: i32, %arg2: i32, %arg3: memref<1x4x8x8xf32, #tpu.memory_space<vmem>>, %arg4: memref<1x4x8x8xf32, #tpu.memory_space<vmem>>, %arg5: memref<1x4x8x8xf32, #tpu.memory_space<vmem>>, %arg6: memref<8x8xf32, #tpu.memory_space<vmem>>, %arg7: memref<1x1x8xf32, #tpu.memory_space<vmem>>, %arg8: memref<1x4x8x8xf32, #tpu.memory_space<vmem>>, %arg9: memref<4x8x1xf32, #tpu.memory_space<vmem>>, %arg10: memref<4x8x1xf32, #tpu.memory_space<vmem>>, %arg11: memref<4x8x8xf32, #tpu.memory_space<vmem>>) attributes {dimension_semantics = [#tpu.dimension_semantics<parallel>, #tpu.dimension_semantics<parallel>, #tpu.dimension_semantics<arbitrary>], iteration_bounds = array<i64: 2, 1, 1>, scalar_prefetch = 0 : i64, scratch_operands = 3 : i64, tpu.core_type = #tpu.core_type<tc>, window_params = [{transform_indices = @transform_0, window_bounds = array<i64: 1, 4, 8, 8>}, {transform_indices = @transform_1, window_bounds = array<i64: 1, 4, 8, 8>}, {transform_indices = @transform_2, window_bounds = array<i64: 1, 4, 8, 8>}, {transform_indices = @transform_3, window_bounds = array<i64: 8, 8>}, {transform_indices = @transform_4, window_bounds = array<i64: 1, 1, 8>}, {transform_indices = @transform_5, window_bounds = array<i64: 1, 4, 8, 8>}]} {
    %c0_i32 = arith.constant 0 : i32
    %0 = arith.cmpi eq, %arg2, %c0_i32 : i32
    %1 = arith.extui %0 : i1 to i32
    %c0_i32_0 = arith.constant 0 : i32
    %2 = arith.cmpi ne, %1, %c0_i32_0 : i32
    scf.if %2 {
      %cst_45 = arith.constant -1.000000e+30 : f32
      %48 = vector.broadcast %cst_45 : f32 to vector<4x8x1xf32>
      %c0_46 = arith.constant 0 : index
      %c0_47 = arith.constant 0 : index
      %c0_48 = arith.constant 0 : index
      %49 = vector.load %arg9[%c0_46, %c0_47, %c0_48] : memref<4x8x1xf32, #tpu.memory_space<vmem>>, vector<4x8x1xf32>
      tpu.vector_store %arg9[%c0_46, %c0_47, %c0_48], %48 {strides = array<i32>} : memref<4x8x1xf32, #tpu.memory_space<vmem>>, vector<4x8x1xf32>,
      %cst_49 = arith.constant 0.000000e+00 : f32
      %50 = vector.broadcast %cst_49 : f32 to vector<4x8x1xf32>
      %c0_50 = arith.constant 0 : index
      %c0_51 = arith.constant 0 : index
      %c0_52 = arith.constant 0 : index
      %51 = vector.load %arg10[%c0_50, %c0_51, %c0_52] : memref<4x8x1xf32, #tpu.memory_space<vmem>>, vector<4x8x1xf32>
      tpu.vector_store %arg10[%c0_50, %c0_51, %c0_52], %50 {strides = array<i32>} : memref<4x8x1xf32, #tpu.memory_space<vmem>>, vector<4x8x1xf32>,
      %cst_53 = arith.constant 0.000000e+00 : f32
      %52 = vector.broadcast %cst_53 : f32 to vector<4x8x8xf32>
      %c0_54 = arith.constant 0 : index
      %c0_55 = arith.constant 0 : index
      %c0_56 = arith.constant 0 : index
      %53 = vector.load %arg11[%c0_54, %c0_55, %c0_56] : memref<4x8x8xf32, #tpu.memory_space<vmem>>, vector<4x8x8xf32>
      tpu.vector_store %arg11[%c0_54, %c0_55, %c0_56], %52 {strides = array<i32>} : memref<4x8x8xf32, #tpu.memory_space<vmem>>, vector<4x8x8xf32>,
    } else {
    }
    %c0 = arith.constant 0 : index
    %c0_1 = arith.constant 0 : index
    %c0_2 = arith.constant 0 : index
    %c0_3 = arith.constant 0 : index
    %3 = vector.load %arg3[%c0, %c0_1, %c0_2, %c0_3] : memref<1x4x8x8xf32, #tpu.memory_space<vmem>>, vector<1x4x8x8xf32>
    %4 = vector.shape_cast %3 : vector<1x4x8x8xf32> to vector<4x8x8xf32>
    %cst = arith.constant 0.353553385 : f32
    %5 = vector.broadcast %cst : f32 to vector<4x8x8xf32>
    %6 = arith.mulf %4, %5 : vector<4x8x8xf32>
    %c0_4 = arith.constant 0 : index
    %c0_5 = arith.constant 0 : index
    %c0_6 = arith.constant 0 : index
    %c0_7 = arith.constant 0 : index
    %7 = vector.load %arg4[%c0_4, %c0_5, %c0_6, %c0_7] : memref<1x4x8x8xf32, #tpu.memory_space<vmem>>, vector<1x4x8x8xf32>
    %8 = vector.shape_cast %7 : vector<1x4x8x8xf32> to vector<4x8x8xf32>
    %c0_8 = arith.constant 0 : index
    %c0_9 = arith.constant 0 : index
    %c0_10 = arith.constant 0 : index
    %c0_11 = arith.constant 0 : index
    %9 = vector.load %arg5[%c0_8, %c0_9, %c0_10, %c0_11] : memref<1x4x8x8xf32, #tpu.memory_space<vmem>>, vector<1x4x8x8xf32>
    %10 = vector.shape_cast %9 : vector<1x4x8x8xf32> to vector<4x8x8xf32>
    "tpu.trace_start"() <{level = 10 : i32, message = "hqd,hkd->hqk"}> : () -> ()
    %cst_12 = arith.constant dense<0.000000e+00> : vector<4x8x8xf32>
    %11 = tpu.matmul %6, %8, %cst_12 {dimension_numbers = #tpu.dot_dimension_numbers<[2], [2], [1], [1], [0, 0, 0, 1, 1, 1], [0], [0]>} : vector<4x8x8xf32>, vector<4x8x8xf32>, vector<4x8x8xf32> -> vector<4x8x8xf32>
    "tpu.trace_stop"() : () -> ()
    %c0_13 = arith.constant 0 : index
    %c0_14 = arith.constant 0 : index
    %12 = vector.load %arg6[%c0_13, %c0_14] : memref<8x8xf32, #tpu.memory_space<vmem>>, vector<8x8xf32>
    %c0_15 = arith.constant 0 : index
    %c0_16 = arith.constant 0 : index
    %c0_17 = arith.constant 0 : index
    %13 = vector.load %arg7[%c0_15, %c0_16, %c0_17] : memref<1x1x8xf32, #tpu.memory_space<vmem>>, vector<1x1x8xf32>
    %14 = vector.shape_cast %13 : vector<1x1x8xf32> to vector<1x8xf32>
    %15 = vector.broadcast %14 : vector<1x8xf32> to vector<8x8xf32>
    %16 = arith.addf %12, %15 : vector<8x8xf32>
    %cst_18 = arith.constant -1.000000e+09 : f32
    %17 = vector.broadcast %cst_18 : f32 to vector<8x8xf32>
    %18 = arith.maximumf %16, %17 : vector<8x8xf32>
    %19 = vector.shape_cast %18 : vector<8x8xf32> to vector<1x8x8xf32>
    %20 = vector.broadcast %19 : vector<1x8x8xf32> to vector<4x8x8xf32>
    %21 = arith.addf %11, %20 : vector<4x8x8xf32>
    %c0_19 = arith.constant 0 : index
    %c0_20 = arith.constant 0 : index
    %c0_21 = arith.constant 0 : index
    %22 = vector.load %arg9[%c0_19, %c0_20, %c0_21] : memref<4x8x1xf32, #tpu.memory_space<vmem>>, vector<4x8x1xf32>
    %cst_22 = arith.constant dense<0xFF800000> : vector<4x8xf32>
    %23 = vector.multi_reduction <maximumf>, %21, %cst_22 [2] : vector<4x8x8xf32> to vector<4x8xf32>
    %24 = vector.shape_cast %23 : vector<4x8xf32> to vector<4x8x1xf32>
    %25 = arith.maximumf %22, %24 : vector<4x8x1xf32>
    %c0_23 = arith.constant 0 : index
    %c0_24 = arith.constant 0 : index
    %c0_25 = arith.constant 0 : index
    %26 = vector.load %arg9[%c0_23, %c0_24, %c0_25] : memref<4x8x1xf32, #tpu.memory_space<vmem>>, vector<4x8x1xf32>
    %27 = arith.subf %26, %25 : vector<4x8x1xf32>
    %28 = math.exp %27 : vector<4x8x1xf32>
    %29 = vector.broadcast %25 : vector<4x8x1xf32> to vector<4x8x8xf32>
    %30 = arith.subf %21, %29 : vector<4x8x8xf32>
    %31 = math.exp %30 : vector<4x8x8xf32>
    %c0_26 = arith.constant 0 : index
    %c0_27 = arith.constant 0 : index
    %c0_28 = arith.constant 0 : index
    %32 = vector.load %arg10[%c0_26, %c0_27, %c0_28] : memref<4x8x1xf32, #tpu.memory_space<vmem>>, vector<4x8x1xf32>
    %33 = arith.mulf %28, %32 : vector<4x8x1xf32>
    %cst_29 = arith.constant dense<0.000000e+00> : vector<4x8xf32>
    %34 = vector.multi_reduction <add>, %31, %cst_29 [2] : vector<4x8x8xf32> to vector<4x8xf32>
    %35 = vector.shape_cast %34 : vector<4x8xf32> to vector<4x8x1xf32>
    %36 = arith.addf %33, %35 : vector<4x8x1xf32>
    %c0_30 = arith.constant 0 : index
    %c0_31 = arith.constant 0 : index
    %c0_32 = arith.constant 0 : index
    %37 = vector.load %arg10[%c0_30, %c0_31, %c0_32] : memref<4x8x1xf32, #tpu.memory_space<vmem>>, vector<4x8x1xf32>
    tpu.vector_store %arg10[%c0_30, %c0_31, %c0_32], %36 {strides = array<i32>} : memref<4x8x1xf32, #tpu.memory_space<vmem>>, vector<4x8x1xf32>,
    %c0_33 = arith.constant 0 : index
    %c0_34 = arith.constant 0 : index
    %c0_35 = arith.constant 0 : index
    %38 = vector.load %arg11[%c0_33, %c0_34, %c0_35] : memref<4x8x8xf32, #tpu.memory_space<vmem>>, vector<4x8x8xf32>
    %39 = vector.broadcast %28 : vector<4x8x1xf32> to vector<4x8x8xf32>
    %40 = arith.mulf %39, %38 : vector<4x8x8xf32>
    "tpu.trace_start"() <{level = 10 : i32, message = "hqk,hkd->hqd"}> : () -> ()
    %cst_36 = arith.constant dense<0.000000e+00> : vector<4x8x8xf32>
    %41 = tpu.matmul %31, %10, %cst_36 {dimension_numbers = #tpu.dot_dimension_numbers<[2], [1], [1], [2], [0, 0, 0, 1, 1, 2], [0], [0]>} : vector<4x8x8xf32>, vector<4x8x8xf32>, vector<4x8x8xf32> -> vector<4x8x8xf32>
    "tpu.trace_stop"() : () -> ()
    %42 = arith.addf %40, %41 : vector<4x8x8xf32>
    %c0_37 = arith.constant 0 : index
    %c0_38 = arith.constant 0 : index
    %c0_39 = arith.constant 0 : index
    %43 = vector.load %arg11[%c0_37, %c0_38, %c0_39] : memref<4x8x8xf32, #tpu.memory_space<vmem>>, vector<4x8x8xf32>
    tpu.vector_store %arg11[%c0_37, %c0_38, %c0_39], %42 {strides = array<i32>} : memref<4x8x8xf32, #tpu.memory_space<vmem>>, vector<4x8x8xf32>,
    %c0_40 = arith.constant 0 : index
    %c0_41 = arith.constant 0 : index
    %c0_42 = arith.constant 0 : index
    %44 = vector.load %arg9[%c0_40, %c0_41, %c0_42] : memref<4x8x1xf32, #tpu.memory_space<vmem>>, vector<4x8x1xf32>
    tpu.vector_store %arg9[%c0_40, %c0_41, %c0_42], %25 {strides = array<i32>} : memref<4x8x1xf32, #tpu.memory_space<vmem>>, vector<4x8x1xf32>,
    %c0_i32_43 = arith.constant 0 : i32
    %45 = arith.cmpi eq, %arg2, %c0_i32_43 : i32
    %46 = arith.extui %45 : i1 to i32
    %c0_i32_44 = arith.constant 0 : i32
    %47 = arith.cmpi ne, %46, %c0_i32_44 : i32
    scf.if %47 {
      %c0_45 = arith.constant 0 : index
      %c0_46 = arith.constant 0 : index
      %c0_47 = arith.constant 0 : index
      %48 = vector.load %arg11[%c0_45, %c0_46, %c0_47] : memref<4x8x8xf32, #tpu.memory_space<vmem>>, vector<4x8x8xf32>
      %c0_48 = arith.constant 0 : index
      %c0_49 = arith.constant 0 : index
      %c0_50 = arith.constant 0 : index
      %49 = vector.load %arg10[%c0_48, %c0_49, %c0_50] : memref<4x8x1xf32, #tpu.memory_space<vmem>>, vector<4x8x1xf32>
      %50 = tpu.reciprocal %49 : vector<4x8x1xf32> -> vector<4x8x1xf32>
      %51 = vector.broadcast %50 : vector<4x8x1xf32> to vector<4x8x8xf32>
      %52 = arith.mulf %48, %51 : vector<4x8x8xf32>
      %c0_51 = arith.constant 0 : index
      %c0_52 = arith.constant 0 : index
      %c0_53 = arith.constant 0 : index
      %c0_54 = arith.constant 0 : index
      %53 = vector.load %arg8[%c0_51, %c0_52, %c0_53, %c0_54] : memref<1x4x8x8xf32, #tpu.memory_space<vmem>>, vector<1x4x8x8xf32>
      %54 = vector.shape_cast %53 : vector<1x4x8x8xf32> to vector<4x8x8xf32>
      %55 = vector.shape_cast %52 : vector<4x8x8xf32> to vector<1x4x8x8xf32>
      tpu.vector_store %arg8[%c0_51, %c0_52, %c0_53, %c0_54], %55 {strides = array<i32>} : memref<1x4x8x8xf32, #tpu.memory_space<vmem>>, vector<1x4x8x8xf32>,
    } else {
    }
    return
  }
  func.func @transform_0(%arg0: i32, %arg1: i32, %arg2: i32) -> (i32, i32, i32, i32) {
    %c0_i32 = arith.constant 0 : i32
    %c0_i32_0 = arith.constant 0 : i32
    %c0_i32_1 = arith.constant 0 : i32
    return %arg0, %c0_i32, %arg1, %c0_i32_0 : i32, i32, i32, i32
  }
  func.func @transform_1(%arg0: i32, %arg1: i32, %arg2: i32) -> (i32, i32, i32, i32) {
    %c0_i32 = arith.constant 0 : i32
    %c0_i32_0 = arith.constant 0 : i32
    %c0_i32_1 = arith.constant 0 : i32
    return %arg0, %c0_i32, %arg2, %c0_i32_0 : i32, i32, i32, i32
  }
  func.func @transform_2(%arg0: i32, %arg1: i32, %arg2: i32) -> (i32, i32, i32, i32) {
    %c0_i32 = arith.constant 0 : i32
    %c0_i32_0 = arith.constant 0 : i32
    %c0_i32_1 = arith.constant 0 : i32
    return %arg0, %c0_i32, %arg2, %c0_i32_0 : i32, i32, i32, i32
  }
  func.func @transform_3(%arg0: i32, %arg1: i32, %arg2: i32) -> (i32, i32) {
    %c0_i32 = arith.constant 0 : i32
    return %arg1, %arg2 : i32, i32
  }
  func.func @transform_4(%arg0: i32, %arg1: i32, %arg2: i32) -> (i32, i32, i32) {
    %c0_i32 = arith.constant 0 : i32
    %c0_i32_0 = arith.constant 0 : i32
    return %arg0, %c0_i32, %arg2 : i32, i32, i32
  }
  func.func @transform_5(%arg0: i32, %arg1: i32, %arg2: i32) -> (i32, i32, i32, i32) {
    %c0_i32 = arith.constant 0 : i32
    %c0_i32_0 = arith.constant 0 : i32
    %c0_i32_1 = arith.constant 0 : i32
    return %arg0, %c0_i32, %arg1, %c0_i32_0 : i32, i32, i32, i32
  }
}

module attributes {stable_mosaic.version = 11 : i64} {
  func.func @_linear_kernel(%arg0: i32, %arg1: memref<16x32xf32, #tpu.memory_space<vmem>>, %arg2: memref<32x32xf32, #tpu.memory_space<vmem>>, %arg3: memref<1x32xf32, #tpu.memory_space<vmem>>, %arg4: memref<16x32xf32, #tpu.memory_space<vmem>>) attributes {dimension_semantics = [#tpu.dimension_semantics<parallel>], iteration_bounds = array<i64: 1>, scalar_prefetch = 0 : i64, scratch_operands = 0 : i64, tpu.core_type = #tpu.core_type<tc>, window_params = [{transform_indices = @transform_0, window_bounds = array<i64: 16, 32>}, {pipeline_mode = #tpu.pipeline_mode<synchronous>, transform_indices = @transform_1, window_bounds = array<i64: 32, 32>}, {pipeline_mode = #tpu.pipeline_mode<synchronous>, transform_indices = @transform_2, window_bounds = array<i64: 1, 32>}, {transform_indices = @transform_3, window_bounds = array<i64: 16, 32>}]} {
    %c0 = arith.constant 0 : index
    %c0_0 = arith.constant 0 : index
    %0 = vector.load %arg1[%c0, %c0_0] : memref<16x32xf32, #tpu.memory_space<vmem>>, vector<16x32xf32>
    %c0_1 = arith.constant 0 : index
    %c0_2 = arith.constant 0 : index
    %1 = vector.load %arg2[%c0_1, %c0_2] : memref<32x32xf32, #tpu.memory_space<vmem>>, vector<32x32xf32>
    %cst = arith.constant dense<0.000000e+00> : vector<16x32xf32>
    %2 = tpu.matmul %0, %1, %cst {dimension_numbers = #tpu.dot_dimension_numbers<[1], [0], [0], [1], [0, 0, 1, 1], [], []>} : vector<16x32xf32>, vector<32x32xf32>, vector<16x32xf32> -> vector<16x32xf32>
    %c0_3 = arith.constant 0 : index
    %c0_4 = arith.constant 0 : index
    %3 = vector.load %arg3[%c0_3, %c0_4] : memref<1x32xf32, #tpu.memory_space<vmem>>, vector<1x32xf32>
    %4 = vector.broadcast %3 : vector<1x32xf32> to vector<16x32xf32>
    %5 = arith.addf %2, %4 : vector<16x32xf32>
    %c0_5 = arith.constant 0 : index
    %c0_6 = arith.constant 0 : index
    %6 = vector.load %arg4[%c0_5, %c0_6] : memref<16x32xf32, #tpu.memory_space<vmem>>, vector<16x32xf32>
    tpu.vector_store %arg4[%c0_5, %c0_6], %5 {strides = array<i32>} : memref<16x32xf32, #tpu.memory_space<vmem>>, vector<16x32xf32>,
    return
  }
  func.func @transform_0(%arg0: i32) -> (i32, i32) {
    %c0_i32 = arith.constant 0 : i32
    %c0_i32_0 = arith.constant 0 : i32
    return %arg0, %c0_i32 : i32, i32
  }
  func.func @transform_1(%arg0: i32) -> (i32, i32) {
    %c0_i32 = arith.constant 0 : i32
    %c0_i32_0 = arith.constant 0 : i32
    %c0_i32_1 = arith.constant 0 : i32
    return %c0_i32, %c0_i32_0 : i32, i32
  }
  func.func @transform_2(%arg0: i32) -> (i32, i32) {
    %c0_i32 = arith.constant 0 : i32
    %c0_i32_0 = arith.constant 0 : i32
    %c0_i32_1 = arith.constant 0 : i32
    return %c0_i32, %c0_i32_0 : i32, i32
  }
  func.func @transform_3(%arg0: i32) -> (i32, i32) {
    %c0_i32 = arith.constant 0 : i32
    %c0_i32_0 = arith.constant 0 : i32
    return %arg0, %c0_i32 : i32, i32
  }
}

module attributes {stable_mosaic.version = 11 : i64} {
  func.func @_residual_ln_kernel(%arg0: i32, %arg1: memref<16x32xf32, #tpu.memory_space<vmem>>, %arg2: memref<16x32xf32, #tpu.memory_space<vmem>>, %arg3: memref<1x32xf32, #tpu.memory_space<vmem>>, %arg4: memref<1x32xf32, #tpu.memory_space<vmem>>, %arg5: memref<16x32xf32, #tpu.memory_space<vmem>>) attributes {dimension_semantics = [#tpu.dimension_semantics<parallel>], iteration_bounds = array<i64: 1>, scalar_prefetch = 0 : i64, scratch_operands = 0 : i64, tpu.core_type = #tpu.core_type<tc>, window_params = [{transform_indices = @transform_0, window_bounds = array<i64: 16, 32>}, {transform_indices = @transform_1, window_bounds = array<i64: 16, 32>}, {pipeline_mode = #tpu.pipeline_mode<synchronous>, transform_indices = @transform_2, window_bounds = array<i64: 1, 32>}, {pipeline_mode = #tpu.pipeline_mode<synchronous>, transform_indices = @transform_3, window_bounds = array<i64: 1, 32>}, {transform_indices = @transform_4, window_bounds = array<i64: 16, 32>}]} {
    %c0 = arith.constant 0 : index
    %c0_0 = arith.constant 0 : index
    %0 = vector.load %arg1[%c0, %c0_0] : memref<16x32xf32, #tpu.memory_space<vmem>>, vector<16x32xf32>
    %c0_1 = arith.constant 0 : index
    %c0_2 = arith.constant 0 : index
    %1 = vector.load %arg2[%c0_1, %c0_2] : memref<16x32xf32, #tpu.memory_space<vmem>>, vector<16x32xf32>
    %2 = arith.addf %0, %1 : vector<16x32xf32>
    %cst = arith.constant dense<0.000000e+00> : vector<16xf32>
    %3 = vector.multi_reduction <add>, %2, %cst [1] : vector<16x32xf32> to vector<16xf32>
    %4 = vector.shape_cast %3 : vector<16xf32> to vector<16x1xf32>
    %cst_3 = arith.constant 3.200000e+01 : f32
    %5 = vector.broadcast %cst_3 : f32 to vector<16x1xf32>
    %6 = arith.divf %4, %5 : vector<16x1xf32>
    %7 = vector.broadcast %6 : vector<16x1xf32> to vector<16x32xf32>
    %8 = arith.subf %2, %7 : vector<16x32xf32>
    %9 = arith.mulf %8, %8 : vector<16x32xf32>
    %cst_4 = arith.constant dense<0.000000e+00> : vector<16xf32>
    %10 = vector.multi_reduction <add>, %9, %cst_4 [1] : vector<16x32xf32> to vector<16xf32>
    %11 = vector.shape_cast %10 : vector<16xf32> to vector<16x1xf32>
    %cst_5 = arith.constant 3.200000e+01 : f32
    %12 = vector.broadcast %cst_5 : f32 to vector<16x1xf32>
    %13 = arith.divf %11, %12 : vector<16x1xf32>
    %14 = vector.broadcast %6 : vector<16x1xf32> to vector<16x32xf32>
    %15 = arith.subf %2, %14 : vector<16x32xf32>
    %cst_6 = arith.constant 9.99999974E-6 : f32
    %16 = vector.broadcast %cst_6 : f32 to vector<16x1xf32>
    %17 = arith.addf %13, %16 : vector<16x1xf32>
    %18 = math.rsqrt %17 : vector<16x1xf32>
    %19 = vector.broadcast %18 : vector<16x1xf32> to vector<16x32xf32>
    %20 = arith.mulf %15, %19 : vector<16x32xf32>
    %c0_7 = arith.constant 0 : index
    %c0_8 = arith.constant 0 : index
    %21 = vector.load %arg3[%c0_7, %c0_8] : memref<1x32xf32, #tpu.memory_space<vmem>>, vector<1x32xf32>
    %22 = vector.broadcast %21 : vector<1x32xf32> to vector<16x32xf32>
    %23 = arith.mulf %20, %22 : vector<16x32xf32>
    %c0_9 = arith.constant 0 : index
    %c0_10 = arith.constant 0 : index
    %24 = vector.load %arg4[%c0_9, %c0_10] : memref<1x32xf32, #tpu.memory_space<vmem>>, vector<1x32xf32>
    %25 = vector.broadcast %24 : vector<1x32xf32> to vector<16x32xf32>
    %26 = arith.addf %23, %25 : vector<16x32xf32>
    %c0_11 = arith.constant 0 : index
    %c0_12 = arith.constant 0 : index
    %27 = vector.load %arg5[%c0_11, %c0_12] : memref<16x32xf32, #tpu.memory_space<vmem>>, vector<16x32xf32>
    tpu.vector_store %arg5[%c0_11, %c0_12], %26 {strides = array<i32>} : memref<16x32xf32, #tpu.memory_space<vmem>>, vector<16x32xf32>,
    return
  }
  func.func @transform_0(%arg0: i32) -> (i32, i32) {
    %c0_i32 = arith.constant 0 : i32
    %c0_i32_0 = arith.constant 0 : i32
    return %arg0, %c0_i32 : i32, i32
  }
  func.func @transform_1(%arg0: i32) -> (i32, i32) {
    %c0_i32 = arith.constant 0 : i32
    %c0_i32_0 = arith.constant 0 : i32
    return %arg0, %c0_i32 : i32, i32
  }
  func.func @transform_2(%arg0: i32) -> (i32, i32) {
    %c0_i32 = arith.constant 0 : i32
    %c0_i32_0 = arith.constant 0 : i32
    %c0_i32_1 = arith.constant 0 : i32
    return %c0_i32, %c0_i32_0 : i32, i32
  }
  func.func @transform_3(%arg0: i32) -> (i32, i32) {
    %c0_i32 = arith.constant 0 : i32
    %c0_i32_0 = arith.constant 0 : i32
    %c0_i32_1 = arith.constant 0 : i32
    return %c0_i32, %c0_i32_0 : i32, i32
  }
  func.func @transform_4(%arg0: i32) -> (i32, i32) {
    %c0_i32 = arith.constant 0 : i32
    %c0_i32_0 = arith.constant 0 : i32
    return %arg0, %c0_i32 : i32, i32
  }
}

module attributes {stable_mosaic.version = 11 : i64} {
  func.func @_linear_kernel(%arg0: i32, %arg1: memref<20x32xf32, #tpu.memory_space<vmem>>, %arg2: memref<32x64xf32, #tpu.memory_space<vmem>>, %arg3: memref<1x64xf32, #tpu.memory_space<vmem>>, %arg4: memref<20x64xf32, #tpu.memory_space<vmem>>) attributes {dimension_semantics = [#tpu.dimension_semantics<parallel>], iteration_bounds = array<i64: 1>, scalar_prefetch = 0 : i64, scratch_operands = 0 : i64, tpu.core_type = #tpu.core_type<tc>, window_params = [{transform_indices = @transform_0, window_bounds = array<i64: 20, 32>}, {pipeline_mode = #tpu.pipeline_mode<synchronous>, transform_indices = @transform_1, window_bounds = array<i64: 32, 64>}, {pipeline_mode = #tpu.pipeline_mode<synchronous>, transform_indices = @transform_2, window_bounds = array<i64: 1, 64>}, {transform_indices = @transform_3, window_bounds = array<i64: 20, 64>}]} {
    %c0 = arith.constant 0 : index
    %c0_0 = arith.constant 0 : index
    %0 = vector.load %arg1[%c0, %c0_0] : memref<20x32xf32, #tpu.memory_space<vmem>>, vector<20x32xf32>
    %c0_1 = arith.constant 0 : index
    %c0_2 = arith.constant 0 : index
    %1 = vector.load %arg2[%c0_1, %c0_2] : memref<32x64xf32, #tpu.memory_space<vmem>>, vector<32x64xf32>
    %cst = arith.constant dense<0.000000e+00> : vector<20x64xf32>
    %2 = tpu.matmul %0, %1, %cst {dimension_numbers = #tpu.dot_dimension_numbers<[1], [0], [0], [1], [0, 0, 1, 1], [], []>} : vector<20x32xf32>, vector<32x64xf32>, vector<20x64xf32> -> vector<20x64xf32>
    %c0_3 = arith.constant 0 : index
    %c0_4 = arith.constant 0 : index
    %3 = vector.load %arg3[%c0_3, %c0_4] : memref<1x64xf32, #tpu.memory_space<vmem>>, vector<1x64xf32>
    %4 = vector.broadcast %3 : vector<1x64xf32> to vector<20x64xf32>
    %5 = arith.addf %2, %4 : vector<20x64xf32>
    %c0_5 = arith.constant 0 : index
    %c0_6 = arith.constant 0 : index
    %6 = vector.load %arg4[%c0_5, %c0_6] : memref<20x64xf32, #tpu.memory_space<vmem>>, vector<20x64xf32>
    tpu.vector_store %arg4[%c0_5, %c0_6], %5 {strides = array<i32>} : memref<20x64xf32, #tpu.memory_space<vmem>>, vector<20x64xf32>,
    return
  }
  func.func @transform_0(%arg0: i32) -> (i32, i32) {
    %c0_i32 = arith.constant 0 : i32
    %c0_i32_0 = arith.constant 0 : i32
    return %arg0, %c0_i32 : i32, i32
  }
  func.func @transform_1(%arg0: i32) -> (i32, i32) {
    %c0_i32 = arith.constant 0 : i32
    %c0_i32_0 = arith.constant 0 : i32
    %c0_i32_1 = arith.constant 0 : i32
    return %c0_i32, %c0_i32_0 : i32, i32
  }
  func.func @transform_2(%arg0: i32) -> (i32, i32) {
    %c0_i32 = arith.constant 0 : i32
    %c0_i32_0 = arith.constant 0 : i32
    %c0_i32_1 = arith.constant 0 : i32
    return %c0_i32, %c0_i32_0 : i32, i32
  }
  func.func @transform_3(%arg0: i32) -> (i32, i32) {
    %c0_i32 = arith.constant 0 : i32
    %c0_i32_0 = arith.constant 0 : i32
    return %arg0, %c0_i32 : i32, i32
  }
}

module attributes {stable_mosaic.version = 11 : i64} {
  func.func @_attn_weights_kernel(%arg0: i32, %arg1: i32, %arg2: memref<1x4x8x8xf32, #tpu.memory_space<vmem>>, %arg3: memref<1x4x10x8xf32, #tpu.memory_space<vmem>>, %arg4: memref<1x4x10x8xf32, #tpu.memory_space<vmem>>, %arg5: memref<1x1x10xf32, #tpu.memory_space<vmem>>, %arg6: memref<1x4x8x8xf32, #tpu.memory_space<vmem>>, %arg7: memref<1x8x10xf32, #tpu.memory_space<vmem>>) attributes {dimension_semantics = [#tpu.dimension_semantics<parallel>, #tpu.dimension_semantics<parallel>], iteration_bounds = array<i64: 2, 1>, scalar_prefetch = 0 : i64, scratch_operands = 0 : i64, tpu.core_type = #tpu.core_type<tc>, window_params = [{transform_indices = @transform_0, window_bounds = array<i64: 1, 4, 8, 8>}, {transform_indices = @transform_1, window_bounds = array<i64: 1, 4, 10, 8>}, {transform_indices = @transform_2, window_bounds = array<i64: 1, 4, 10, 8>}, {transform_indices = @transform_3, window_bounds = array<i64: 1, 1, 10>}, {transform_indices = @transform_4, window_bounds = array<i64: 1, 4, 8, 8>}, {transform_indices = @transform_5, window_bounds = array<i64: 1, 8, 10>}]} {
    %c0 = arith.constant 0 : index
    %c0_0 = arith.constant 0 : index
    %c0_1 = arith.constant 0 : index
    %c0_2 = arith.constant 0 : index
    %0 = vector.load %arg2[%c0, %c0_0, %c0_1, %c0_2] : memref<1x4x8x8xf32, #tpu.memory_space<vmem>>, vector<1x4x8x8xf32>
    %1 = vector.shape_cast %0 : vector<1x4x8x8xf32> to vector<4x8x8xf32>
    %cst = arith.constant 0.353553385 : f32
    %2 = vector.broadcast %cst : f32 to vector<4x8x8xf32>
    %3 = arith.mulf %1, %2 : vector<4x8x8xf32>
    %c0_3 = arith.constant 0 : index
    %c0_4 = arith.constant 0 : index
    %c0_5 = arith.constant 0 : index
    %c0_6 = arith.constant 0 : index
    %4 = vector.load %arg3[%c0_3, %c0_4, %c0_5, %c0_6] : memref<1x4x10x8xf32, #tpu.memory_space<vmem>>, vector<1x4x10x8xf32>
    %5 = vector.shape_cast %4 : vector<1x4x10x8xf32> to vector<4x10x8xf32>
    %c0_7 = arith.constant 0 : index
    %c0_8 = arith.constant 0 : index
    %c0_9 = arith.constant 0 : index
    %c0_10 = arith.constant 0 : index
    %6 = vector.load %arg4[%c0_7, %c0_8, %c0_9, %c0_10] : memref<1x4x10x8xf32, #tpu.memory_space<vmem>>, vector<1x4x10x8xf32>
    %7 = vector.shape_cast %6 : vector<1x4x10x8xf32> to vector<4x10x8xf32>
    "tpu.trace_start"() <{level = 10 : i32, message = "hqd,hkd->hqk"}> : () -> ()
    %cst_11 = arith.constant dense<0.000000e+00> : vector<4x8x10xf32>
    %8 = tpu.matmul %3, %5, %cst_11 {dimension_numbers = #tpu.dot_dimension_numbers<[2], [2], [1], [1], [0, 0, 0, 1, 1, 1], [0], [0]>} : vector<4x8x8xf32>, vector<4x10x8xf32>, vector<4x8x10xf32> -> vector<4x8x10xf32>
    "tpu.trace_stop"() : () -> ()
    %c0_12 = arith.constant 0 : index
    %c0_13 = arith.constant 0 : index
    %c0_14 = arith.constant 0 : index
    %9 = vector.load %arg5[%c0_12, %c0_13, %c0_14] : memref<1x1x10xf32, #tpu.memory_space<vmem>>, vector<1x1x10xf32>
    %10 = vector.shape_cast %9 : vector<1x1x10xf32> to vector<1x10xf32>
    %11 = vector.shape_cast %10 : vector<1x10xf32> to vector<1x1x10xf32>
    %12 = vector.broadcast %11 : vector<1x1x10xf32> to vector<4x8x10xf32>
    %13 = arith.addf %8, %12 : vector<4x8x10xf32>
    %cst_15 = arith.constant dense<0xFF800000> : vector<4x8xf32>
    %14 = vector.multi_reduction <maximumf>, %13, %cst_15 [2] : vector<4x8x10xf32> to vector<4x8xf32>
    %15 = vector.shape_cast %14 : vector<4x8xf32> to vector<4x8x1xf32>
    %16 = vector.broadcast %15 : vector<4x8x1xf32> to vector<4x8x10xf32>
    %17 = arith.subf %13, %16 : vector<4x8x10xf32>
    %18 = math.exp %17 : vector<4x8x10xf32>
    %cst_16 = arith.constant dense<0.000000e+00> : vector<4x8xf32>
    %19 = vector.multi_reduction <add>, %18, %cst_16 [2] : vector<4x8x10xf32> to vector<4x8xf32>
    %20 = vector.shape_cast %19 : vector<4x8xf32> to vector<4x8x1xf32>
    %21 = tpu.reciprocal %20 : vector<4x8x1xf32> -> vector<4x8x1xf32>
    %22 = vector.broadcast %21 : vector<4x8x1xf32> to vector<4x8x10xf32>
    %23 = arith.mulf %18, %22 : vector<4x8x10xf32>
    "tpu.trace_start"() <{level = 10 : i32, message = "hqk,hkd->hqd"}> : () -> ()
    %cst_17 = arith.constant dense<0.000000e+00> : vector<4x8x8xf32>
    %24 = tpu.matmul %23, %7, %cst_17 {dimension_numbers = #tpu.dot_dimension_numbers<[2], [1], [1], [2], [0, 0, 0, 1, 1, 2], [0], [0]>} : vector<4x8x10xf32>, vector<4x10x8xf32>, vector<4x8x8xf32> -> vector<4x8x8xf32>
    "tpu.trace_stop"() : () -> ()
    %c0_18 = arith.constant 0 : index
    %c0_19 = arith.constant 0 : index
    %c0_20 = arith.constant 0 : index
    %c0_21 = arith.constant 0 : index
    %25 = vector.load %arg6[%c0_18, %c0_19, %c0_20, %c0_21] : memref<1x4x8x8xf32, #tpu.memory_space<vmem>>, vector<1x4x8x8xf32>
    %26 = vector.shape_cast %25 : vector<1x4x8x8xf32> to vector<4x8x8xf32>
    %27 = vector.shape_cast %24 : vector<4x8x8xf32> to vector<1x4x8x8xf32>
    tpu.vector_store %arg6[%c0_18, %c0_19, %c0_20, %c0_21], %27 {strides = array<i32>} : memref<1x4x8x8xf32, #tpu.memory_space<vmem>>, vector<1x4x8x8xf32>,
    %cst_22 = arith.constant dense<0.000000e+00> : vector<8x10xf32>
    %28 = vector.multi_reduction <add>, %23, %cst_22 [0] : vector<4x8x10xf32> to vector<8x10xf32>
    %cst_23 = arith.constant 2.500000e-01 : f32
    %29 = vector.broadcast %cst_23 : f32 to vector<8x10xf32>
    %30 = arith.mulf %28, %29 : vector<8x10xf32>
    %c0_24 = arith.constant 0 : index
    %c0_25 = arith.constant 0 : index
    %c0_26 = arith.constant 0 : index
    %31 = vector.load %arg7[%c0_24, %c0_25, %c0_26] : memref<1x8x10xf32, #tpu.memory_space<vmem>>, vector<1x8x10xf32>
    %32 = vector.shape_cast %31 : vector<1x8x10xf32> to vector<8x10xf32>
    %33 = vector.shape_cast %30 : vector<8x10xf32> to vector<1x8x10xf32>
    tpu.vector_store %arg7[%c0_24, %c0_25, %c0_26], %33 {strides = array<i32>} : memref<1x8x10xf32, #tpu.memory_space<vmem>>, vector<1x8x10xf32>,
    return
  }
  func.func @transform_0(%arg0: i32, %arg1: i32) -> (i32, i32, i32, i32) {
    %c0_i32 = arith.constant 0 : i32
    %c0_i32_0 = arith.constant 0 : i32
    %c0_i32_1 = arith.constant 0 : i32
    return %arg0, %c0_i32, %arg1, %c0_i32_0 : i32, i32, i32, i32
  }
  func.func @transform_1(%arg0: i32, %arg1: i32) -> (i32, i32, i32, i32) {
    %c0_i32 = arith.constant 0 : i32
    %c0_i32_0 = arith.constant 0 : i32
    %c0_i32_1 = arith.constant 0 : i32
    %c0_i32_2 = arith.constant 0 : i32
    return %arg0, %c0_i32, %c0_i32_0, %c0_i32_1 : i32, i32, i32, i32
  }
  func.func @transform_2(%arg0: i32, %arg1: i32) -> (i32, i32, i32, i32) {
    %c0_i32 = arith.constant 0 : i32
    %c0_i32_0 = arith.constant 0 : i32
    %c0_i32_1 = arith.constant 0 : i32
    %c0_i32_2 = arith.constant 0 : i32
    return %arg0, %c0_i32, %c0_i32_0, %c0_i32_1 : i32, i32, i32, i32
  }
  func.func @transform_3(%arg0: i32, %arg1: i32) -> (i32, i32, i32) {
    %c0_i32 = arith.constant 0 : i32
    %c0_i32_0 = arith.constant 0 : i32
    %c0_i32_1 = arith.constant 0 : i32
    return %arg0, %c0_i32, %c0_i32_0 : i32, i32, i32
  }
  func.func @transform_4(%arg0: i32, %arg1: i32) -> (i32, i32, i32, i32) {
    %c0_i32 = arith.constant 0 : i32
    %c0_i32_0 = arith.constant 0 : i32
    %c0_i32_1 = arith.constant 0 : i32
    return %arg0, %c0_i32, %arg1, %c0_i32_0 : i32, i32, i32, i32
  }
  func.func @transform_5(%arg0: i32, %arg1: i32) -> (i32, i32, i32) {
    %c0_i32 = arith.constant 0 : i32
    %c0_i32_0 = arith.constant 0 : i32
    return %arg0, %arg1, %c0_i32 : i32, i32, i32
  }
}

module attributes {stable_mosaic.version = 11 : i64} {
  func.func @_ffn_kernel(%arg0: i32, %arg1: i32, %arg2: memref<16x32xf32, #tpu.memory_space<vmem>>, %arg3: memref<32x64xf32, #tpu.memory_space<vmem>>, %arg4: memref<1x64xf32, #tpu.memory_space<vmem>>, %arg5: memref<64x32xf32, #tpu.memory_space<vmem>>, %arg6: memref<1x32xf32, #tpu.memory_space<vmem>>, %arg7: memref<16x32xf32, #tpu.memory_space<vmem>>, %arg8: memref<1x32xf32, #tpu.memory_space<vmem>>, %arg9: memref<1x32xf32, #tpu.memory_space<vmem>>, %arg10: memref<16x32xf32, #tpu.memory_space<vmem>>, %arg11: memref<16x32xf32, #tpu.memory_space<vmem>>) attributes {dimension_semantics = [#tpu.dimension_semantics<parallel>, #tpu.dimension_semantics<arbitrary>], iteration_bounds = array<i64: 1, 1>, scalar_prefetch = 0 : i64, scratch_operands = 1 : i64, tpu.core_type = #tpu.core_type<tc>, window_params = [{transform_indices = @transform_0, window_bounds = array<i64: 16, 32>}, {transform_indices = @transform_1, window_bounds = array<i64: 32, 64>}, {transform_indices = @transform_2, window_bounds = array<i64: 1, 64>}, {transform_indices = @transform_3, window_bounds = array<i64: 64, 32>}, {pipeline_mode = #tpu.pipeline_mode<synchronous>, transform_indices = @transform_4, window_bounds = array<i64: 1, 32>}, {transform_indices = @transform_5, window_bounds = array<i64: 16, 32>}, {pipeline_mode = #tpu.pipeline_mode<synchronous>, transform_indices = @transform_6, window_bounds = array<i64: 1, 32>}, {pipeline_mode = #tpu.pipeline_mode<synchronous>, transform_indices = @transform_7, window_bounds = array<i64: 1, 32>}, {transform_indices = @transform_8, window_bounds = array<i64: 16, 32>}]} {
    %c0_i32 = arith.constant 0 : i32
    %0 = arith.cmpi eq, %arg1, %c0_i32 : i32
    %1 = arith.extui %0 : i1 to i32
    %c0_i32_0 = arith.constant 0 : i32
    %2 = arith.cmpi ne, %1, %c0_i32_0 : i32
    scf.if %2 {
      %cst_16 = arith.constant 0.000000e+00 : f32
      %19 = vector.broadcast %cst_16 : f32 to vector<16x32xf32>
      %c0_17 = arith.constant 0 : index
      %c0_18 = arith.constant 0 : index
      %20 = vector.load %arg11[%c0_17, %c0_18] : memref<16x32xf32, #tpu.memory_space<vmem>>, vector<16x32xf32>
      tpu.vector_store %arg11[%c0_17, %c0_18], %19 {strides = array<i32>} : memref<16x32xf32, #tpu.memory_space<vmem>>, vector<16x32xf32>,
    } else {
    }
    %c0 = arith.constant 0 : index
    %c0_1 = arith.constant 0 : index
    %3 = vector.load %arg2[%c0, %c0_1] : memref<16x32xf32, #tpu.memory_space<vmem>>, vector<16x32xf32>
    %c0_2 = arith.constant 0 : index
    %c0_3 = arith.constant 0 : index
    %4 = vector.load %arg3[%c0_2, %c0_3] : memref<32x64xf32, #tpu.memory_space<vmem>>, vector<32x64xf32>
    %cst = arith.constant dense<0.000000e+00> : vector<16x64xf32>
    %5 = tpu.matmul %3, %4, %cst {dimension_numbers = #tpu.dot_dimension_numbers<[1], [0], [0], [1], [0, 0, 1, 1], [], []>} : vector<16x32xf32>, vector<32x64xf32>, vector<16x64xf32> -> vector<16x64xf32>
    %c0_4 = arith.constant 0 : index
    %c0_5 = arith.constant 0 : index
    %6 = vector.load %arg4[%c0_4, %c0_5] : memref<1x64xf32, #tpu.memory_space<vmem>>, vector<1x64xf32>
    %7 = vector.broadcast %6 : vector<1x64xf32> to vector<16x64xf32>
    %8 = arith.addf %5, %7 : vector<16x64xf32>
    %cst_6 = arith.constant 0.000000e+00 : f32
    %9 = vector.broadcast %cst_6 : f32 to vector<16x64xf32>
    %10 = arith.maximumf %8, %9 : vector<16x64xf32>
    %c0_7 = arith.constant 0 : index
    %c0_8 = arith.constant 0 : index
    %11 = vector.load %arg11[%c0_7, %c0_8] : memref<16x32xf32, #tpu.memory_space<vmem>>, vector<16x32xf32>
    %c0_9 = arith.constant 0 : index
    %c0_10 = arith.constant 0 : index
    %12 = vector.load %arg5[%c0_9, %c0_10] : memref<64x32xf32, #tpu.memory_space<vmem>>, vector<64x32xf32>
    %cst_11 = arith.constant dense<0.000000e+00> : vector<16x32xf32>
    %13 = tpu.matmul %10, %12, %cst_11 {dimension_numbers = #tpu.dot_dimension_numbers<[1], [0], [0], [1], [0, 0, 1, 1], [], []>} : vector<16x64xf32>, vector<64x32xf32>, vector<16x32xf32> -> vector<16x32xf32>
    %14 = arith.addf %11, %13 : vector<16x32xf32>
    %c0_12 = arith.constant 0 : index
    %c0_13 = arith.constant 0 : index
    %15 = vector.load %arg11[%c0_12, %c0_13] : memref<16x32xf32, #tpu.memory_space<vmem>>, vector<16x32xf32>
    tpu.vector_store %arg11[%c0_12, %c0_13], %14 {strides = array<i32>} : memref<16x32xf32, #tpu.memory_space<vmem>>, vector<16x32xf32>,
    %c0_i32_14 = arith.constant 0 : i32
    %16 = arith.cmpi eq, %arg1, %c0_i32_14 : i32
    %17 = arith.extui %16 : i1 to i32
    %c0_i32_15 = arith.constant 0 : i32
    %18 = arith.cmpi ne, %17, %c0_i32_15 : i32
    scf.if %18 {
      %c0_16 = arith.constant 0 : index
      %c0_17 = arith.constant 0 : index
      %19 = vector.load %arg11[%c0_16, %c0_17] : memref<16x32xf32, #tpu.memory_space<vmem>>, vector<16x32xf32>
      %c0_18 = arith.constant 0 : index
      %c0_19 = arith.constant 0 : index
      %20 = vector.load %arg6[%c0_18, %c0_19] : memref<1x32xf32, #tpu.memory_space<vmem>>, vector<1x32xf32>
      %21 = vector.broadcast %20 : vector<1x32xf32> to vector<16x32xf32>
      %22 = arith.addf %19, %21 : vector<16x32xf32>
      %c0_20 = arith.constant 0 : index
      %c0_21 = arith.constant 0 : index
      %23 = vector.load %arg7[%c0_20, %c0_21] : memref<16x32xf32, #tpu.memory_space<vmem>>, vector<16x32xf32>
      %24 = arith.addf %22, %23 : vector<16x32xf32>
      %cst_22 = arith.constant dense<0.000000e+00> : vector<16xf32>
      %25 = vector.multi_reduction <add>, %24, %cst_22 [1] : vector<16x32xf32> to vector<16xf32>
      %26 = vector.shape_cast %25 : vector<16xf32> to vector<16x1xf32>
      %cst_23 = arith.constant 3.200000e+01 : f32
      %27 = vector.broadcast %cst_23 : f32 to vector<16x1xf32>
      %28 = arith.divf %26, %27 : vector<16x1xf32>
      %29 = vector.broadcast %28 : vector<16x1xf32> to vector<16x32xf32>
      %30 = arith.subf %24, %29 : vector<16x32xf32>
      %31 = arith.mulf %30, %30 : vector<16x32xf32>
      %cst_24 = arith.constant dense<0.000000e+00> : vector<16xf32>
      %32 = vector.multi_reduction <add>, %31, %cst_24 [1] : vector<16x32xf32> to vector<16xf32>
      %33 = vector.shape_cast %32 : vector<16xf32> to vector<16x1xf32>
      %cst_25 = arith.constant 3.200000e+01 : f32
      %34 = vector.broadcast %cst_25 : f32 to vector<16x1xf32>
      %35 = arith.divf %33, %34 : vector<16x1xf32>
      %36 = vector.broadcast %28 : vector<16x1xf32> to vector<16x32xf32>
      %37 = arith.subf %24, %36 : vector<16x32xf32>
      %cst_26 = arith.constant 9.99999974E-6 : f32
      %38 = vector.broadcast %cst_26 : f32 to vector<16x1xf32>
      %39 = arith.addf %35, %38 : vector<16x1xf32>
      %40 = math.rsqrt %39 : vector<16x1xf32>
      %41 = vector.broadcast %40 : vector<16x1xf32> to vector<16x32xf32>
      %42 = arith.mulf %37, %41 : vector<16x32xf32>
      %c0_27 = arith.constant 0 : index
      %c0_28 = arith.constant 0 : index
      %43 = vector.load %arg8[%c0_27, %c0_28] : memref<1x32xf32, #tpu.memory_space<vmem>>, vector<1x32xf32>
      %44 = vector.broadcast %43 : vector<1x32xf32> to vector<16x32xf32>
      %45 = arith.mulf %42, %44 : vector<16x32xf32>
      %c0_29 = arith.constant 0 : index
      %c0_30 = arith.constant 0 : index
      %46 = vector.load %arg9[%c0_29, %c0_30] : memref<1x32xf32, #tpu.memory_space<vmem>>, vector<1x32xf32>
      %47 = vector.broadcast %46 : vector<1x32xf32> to vector<16x32xf32>
      %48 = arith.addf %45, %47 : vector<16x32xf32>
      %c0_31 = arith.constant 0 : index
      %c0_32 = arith.constant 0 : index
      %49 = vector.load %arg10[%c0_31, %c0_32] : memref<16x32xf32, #tpu.memory_space<vmem>>, vector<16x32xf32>
      tpu.vector_store %arg10[%c0_31, %c0_32], %48 {strides = array<i32>} : memref<16x32xf32, #tpu.memory_space<vmem>>, vector<16x32xf32>,
    } else {
    }
    return
  }
  func.func @transform_0(%arg0: i32, %arg1: i32) -> (i32, i32) {
    %c0_i32 = arith.constant 0 : i32
    %c0_i32_0 = arith.constant 0 : i32
    return %arg0, %c0_i32 : i32, i32
  }
  func.func @transform_1(%arg0: i32, %arg1: i32) -> (i32, i32) {
    %c0_i32 = arith.constant 0 : i32
    %c0_i32_0 = arith.constant 0 : i32
    return %c0_i32, %arg1 : i32, i32
  }
  func.func @transform_2(%arg0: i32, %arg1: i32) -> (i32, i32) {
    %c0_i32 = arith.constant 0 : i32
    %c0_i32_0 = arith.constant 0 : i32
    return %c0_i32, %arg1 : i32, i32
  }
  func.func @transform_3(%arg0: i32, %arg1: i32) -> (i32, i32) {
    %c0_i32 = arith.constant 0 : i32
    %c0_i32_0 = arith.constant 0 : i32
    return %arg1, %c0_i32 : i32, i32
  }
  func.func @transform_4(%arg0: i32, %arg1: i32) -> (i32, i32) {
    %c0_i32 = arith.constant 0 : i32
    %c0_i32_0 = arith.constant 0 : i32
    %c0_i32_1 = arith.constant 0 : i32
    return %c0_i32, %c0_i32_0 : i32, i32
  }
  func.func @transform_5(%arg0: i32, %arg1: i32) -> (i32, i32) {
    %c0_i32 = arith.constant 0 : i32
    %c0_i32_0 = arith.constant 0 : i32
    return %arg0, %c0_i32 : i32, i32
  }
  func.func @transform_6(%arg0: i32, %arg1: i32) -> (i32, i32) {
    %c0_i32 = arith.constant 0 : i32
    %c0_i32_0 = arith.constant 0 : i32
    %c0_i32_1 = arith.constant 0 : i32
    return %c0_i32, %c0_i32_0 : i32, i32
  }
  func.func @transform_7(%arg0: i32, %arg1: i32) -> (i32, i32) {
    %c0_i32 = arith.constant 0 : i32
    %c0_i32_0 = arith.constant 0 : i32
    %c0_i32_1 = arith.constant 0 : i32
    return %c0_i32, %c0_i32_0 : i32, i32
  }
  func.func @transform_8(%arg0: i32, %arg1: i32) -> (i32, i32) {
    %c0_i32 = arith.constant 0 : i32
    %c0_i32_0 = arith.constant 0 : i32
    return %arg0, %c0_i32 : i32, i32
  }
}

</mosaic_0001>

<bundles_post_ra>
// kernel: transformer_decoder_layer.10
= control target key start
LH: loop header
LB: loop body
LE: loop exit
PB: predicated region body
PF: predicated region fallthrough
CT: control target
= control target key end

     0   :  { %vm27_vm0 = vcmask 261120   ;;  %vm109_vm1 = vcmask 785408   ;;  %s191_s1 = inlined_call_operand.vmem [shape: f32[32,96], index: 1, kind: input, shape index: {}]   ;;  %s192_s0 = inlined_call_operand.vmem [shape: f32[16,32], index: 0, kind: input, shape index: {}]   ;;  %s193_s2 = inlined_call_operand.vmem [shape: f32[1,96], index: 2, kind: input, shape index: {}]   ;;  %s194_s3 = inlined_call_operand.vmem [shape: f32[16,96], index: 3, kind: output, shape index: {}]  }
   0x1   :  { %v16_v0 = vld [vmem:[%s191_s1] sm:$0xff]  ;;  %v17_v1 = vld [vmem:[%s191_s1 + $0x8] sm:$0xff]  ;;  %v18_v2 = vld [vmem:[%s191_s1 + $0x10] sm:$0xff] }
   0x2   :  { %v136_v3 = vpack.c.bf16 %v17_v1, %v16_v0  ;;  %v19_v4 = vld [vmem:[%s191_s1 + $0x18] sm:$0xff]  ;;  %v14_v5 = vld [vmem:[%s192_s0] sm:$0xff]  ;;  %v15_v7 = vld [vmem:[%s192_s0 + $0x8] sm:$0xff] }
   0x3   :  { %v140_v6 = vpack.c.bf16 %v19_v4, %v18_v2  ;;  %133 = vmatprep.mubr.msk.f32.mxu0 %vm27_vm0, %v14_v5  ;;  %v116_v8 = vld [vmem:[%s193_s2] ss:$0 sm:$0xff] }
   0x4   :  { %137 = vmatprep.subr.bf16.mxu0 %v136_v3 }
   0x5   :  { %139 = vmatpush3.bf16.msra.mxu0 %v136_v3 }
   0x6   :  { %141 = vmatprep.subr.bf16.mxu0 %v140_v6 }
   0x9   :  { %143 = vmatpush3.bf16.msra.mxu0 %v140_v6 }
   0xc   :  { %134 = vmatmul.mubr.msk.f32.vlgmr.msra.gmra.mrb[0].mxu0 %vm27_vm0, %v15_v7 }
  0xdf   :  { %v135_v9 = vpop.f32.mrb[0].mxu0 }
  0xe0   :  { %v106_v10 = vadd.f32 %v135_v9, %v116_v8  ;;  %v100_v11 = vpop.f32.mrb[1].mxu0 }
  0xe1   :  { %v101_v12 = vadd.f32 %v116_v8, %v100_v11 }
  0xe2   :  { %111 = vst.msk [vmem:[%s194_s3 + $0x8] sm:$0xff] %vm109_vm1, %v106_v10 }
  0xe3   :  { %110 = vst.msk [vmem:[%s194_s3] sm:$0xff] %vm109_vm1, %v101_v12 }

// kernel: transformer_decoder_layer.12
= control target key start
LH: loop header
LB: loop body
LE: loop exit
PB: predicated region body
PF: predicated region fallthrough
CT: control target
= control target key end

     0   :  { %vm27_vm0 = vcmask 261120   ;;  %s194_s1 = inlined_call_operand.vmem [shape: f32[32,32], index: 1, kind: input, shape index: {}]   ;;  %s195_s0 = inlined_call_operand.vmem [shape: f32[16,32], index: 0, kind: input, shape index: {}]   ;;  %s196_s2 = inlined_call_operand.vmem [shape: f32[1,32], index: 2, kind: input, shape index: {}]   ;;  %s197_s3 = inlined_call_operand.vmem [shape: f32[16,32], index: 3, kind: output, shape index: {}]  }
   0x1   :  { %v16_v0 = vld [vmem:[%s194_s1] sm:$0xff]  ;;  %v17_v1 = vld [vmem:[%s194_s1 + $0x8] sm:$0xff]  ;;  %v18_v2 = vld [vmem:[%s194_s1 + $0x10] sm:$0xff] }
   0x2   :  { %v135_v3 = vpack.c.bf16 %v17_v1, %v16_v0  ;;  %v19_v4 = vld [vmem:[%s194_s1 + $0x18] sm:$0xff]  ;;  %v14_v5 = vld [vmem:[%s195_s0] sm:$0xff]  ;;  %v15_v7 = vld [vmem:[%s195_s0 + $0x8] sm:$0xff] }
   0x3   :  { %v139_v6 = vpack.c.bf16 %v19_v4, %v18_v2  ;;  %132 = vmatprep.mubr.msk.f32.mxu0 %vm27_vm0, %v14_v5  ;;  %v115_v8 = vld [vmem:[%s196_s2] ss:$0 sm:$0xff] }
   0x4   :  { %136 = vmatprep.subr.bf16.mxu0 %v135_v3 }
   0x5   :  { %138 = vmatpush3.bf16.msra.mxu0 %v135_v3 }
   0x6   :  { %140 = vmatprep.subr.bf16.mxu0 %v139_v6 }
   0x9   :  { %142 = vmatpush3.bf16.msra.mxu0 %v139_v6 }
   0xc   :  { %133 = vmatmul.mubr.msk.f32.vlgmr.msra.gmra.mrb[0].mxu0 %vm27_vm0, %v15_v7 }
  0xdf   :  { %v134_v9 = vpop.f32.mrb[0].mxu0 }
  0xe0   :  { %v106_v10 = vadd.f32 %v134_v9, %v115_v8  ;;  %v100_v11 = vpop.f32.mrb[1].mxu0 }
  0xe1   :  { %v101_v12 = vadd.f32 %v115_v8, %v100_v11 }
  0xe2   :  { %110 = vst.msk [vmem:[%s197_s3 + $0x8] sm:$0xff] %vm27_vm0, %v106_v10 }
  0xe3   :  { %109 = vst.msk [vmem:[%s197_s3] sm:$0xff] %vm27_vm0, %v101_v12 }

// kernel: transformer_decoder_layer.13
= control target key start
LH: loop header
LB: loop body
LE: loop exit
PB: predicated region body
PF: predicated region fallthrough
CT: control target
= control target key end

     0   :  { %vm23_vm0 = vcmask 261120   ;;  %s136_s0 = inlined_call_operand.vmem [shape: f32[16,32], index: 0, kind: input, shape index: {}]   ;;  %s137_s1 = inlined_call_operand.vmem [shape: f32[16,32], index: 1, kind: input, shape index: {}]   ;;  %s138_s2 = inlined_call_operand.vmem [shape: f32[1,32], index: 2, kind: input, shape index: {}]   ;;  %s139_s3 = inlined_call_operand.vmem [shape: f32[1,32], index: 3, kind: input, shape index: {}]   ;;  %s140_s4 = inlined_call_operand.vmem [shape: f32[16,32], index: 4, kind: output, shape index: {}]  }
   0x1   :  { %v17_v0 = vld [vmem:[%s136_s0] sm:$0xff]  ;;  %v18_v2 = vld [vmem:[%s136_s0 + $0x8] sm:$0xff] }
   0x2   :  { %v19_v1 = vld [vmem:[%s137_s1] sm:$0xff]  ;;  %v20_v4 = vld [vmem:[%s137_s1 + $0x8] sm:$0xff] }
   0x3   :  { %v21_v3 = vadd.f32 %v19_v1, %v17_v0  ;;  %v22_v5 = vadd.f32 %v20_v4, %v18_v2  ;;  %v75_v25 = vld [vmem:[%s138_s2] ss:$0 sm:$0xff] }
   0x4   :  { %v76_v27 = vld [vmem:[%s139_s3] ss:$0 sm:$0xff] }
   0x5   :  { %v24_v6 = vsel %vm23_vm0, %v21_v3, 0.0  ;;  %v27_v7 = vsel %vm23_vm0, %v22_v5, 0.0 }
   0x6   :  { %25 = vadd.xlane.f32.xlu0 %v24_v6 }
   0xa   :  { %28 = vadd.xlane.f32.xlu0 %v27_v7 }
  0x93   :  { %v26_v8 = vpop.xlane.xlu0 %25 }
  0x94   :  { %v31_v9 = vmul.f32 0.03125, %v26_v8 }
  0x96   :  { %v33_v10 = vsub.f32 %v21_v3, %v31_v9 }
  0x97   :  { %v29_v11 = vpop.xlane.xlu0 %28 }
  0x98   :  { %v32_v12 = vmul.f32 0.03125, %v29_v11  ;;  %v35_v13 = vmul.f32 %v33_v10, %v33_v10 }
  0x9a   :  { %v34_v14 = vsub.f32 %v22_v5, %v32_v12  ;;  %v37_v15 = vsel %vm23_vm0, %v35_v13, 0.0 }
  0x9b   :  { %38 = vadd.xlane.f32.xlu1 %v37_v15 }
  0x9c   :  { %v36_v16 = vmul.f32 %v34_v14, %v34_v14 }
  0x9e   :  { %v40_v17 = vsel %vm23_vm0, %v36_v16, 0.0 }
  0x9f   :  { %41 = vadd.xlane.f32.xlu1 %v40_v17 }
 0x128   :  { %v39_v18 = vpop.xlane.xlu1 %38 }
 0x129   :  { %v43_v19 = vmul.f32 0.03125, %v39_v18 }
 0x12b   :  { %v45_v20 = vadd.f32 1e-05, %v43_v19 }
 0x12c   :  { %v42_v21 = vpop.xlane.xlu1 %41 }
 0x12d   :  { %77 = vrsqrt.f32 %v45_v20  ;;  %v44_v22 = vmul.f32 0.03125, %v42_v21 }
 0x12f   :  { %v46_v23 = vadd.f32 1e-05, %v44_v22 }
 0x131   :  { %79 = vrsqrt.f32 %v46_v23 }
 0x137   :  { %v78_v24 = vpop.eup %77 }
 0x138   :  { %v49_v26 = vmul.f32 %v78_v24, %v33_v10 }
 0x13a   :  { %v58_v28 = vmul.f32 %v75_v25, %v49_v26 }
 0x13b   :  { %v80_v29 = vpop.eup %79 }
 0x13c   :  { %v67_v30 = vadd.f32 %v76_v27, %v58_v28  ;;  %v50_v31 = vmul.f32 %v80_v29, %v34_v14 }
 0x13e   :  { %69 = vst.msk [vmem:[%s140_s4] sm:$0xff] %vm23_vm0, %v67_v30  ;;  %v59_v32 = vmul.f32 %v75_v25, %v50_v31 }
 0x140   :  { %v68_v33 = vadd.f32 %v76_v27, %v59_v32 }
 0x142   :  { %70 = vst.msk [vmem:[%s140_s4 + $0x8] sm:$0xff] %vm23_vm0, %v68_v33 }

// kernel: transformer_decoder_layer.11
= control target key start
LH: loop header
LB: loop body
LE: loop exit
PB: predicated region body
PF: predicated region fallthrough
CT: control target
= control target key end

     0   :  { %s1549_s18 = smov 0   ;;  %s1551_s19 = smov 0   ;;  %s1708_s0 = inlined_call_operand.vmem [shape: f32[2,4,8,8], index: 0, kind: input, shape index: {}]   ;;  %s1709_s1 = inlined_call_operand.vmem [shape: f32[2,4,8,8], index: 1, kind: input, shape index: {}]   ;;  %s1710_s2 = inlined_call_operand.vmem [shape: f32[2,4,8,8], index: 2, kind: input, shape index: {}]   ;;  %s1711_s3 = inlined_call_operand.vmem [shape: f32[8,8], index: 3, kind: input, shape index: {}]   ;;  %s1712_s4 = inlined_call_operand.vmem [shape: f32[2,1,8], index: 4, kind: input, shape index: {}]   ;;  %s1713_s5 = inlined_call_operand.vmem [shape: f32[2,4,8,8], index: 5, kind: output, shape index: {}]  }
   0x1   :  { %s1553_s20 = smov 0  }
   0x2 LB: > { %s34_s21 = sadd.s32 1, %s1509_s19  ;;  %p1353_p0 = scmp.ge.s32.totalorder %s1513_s20, 1  ;;  %s1513_s20 = sphi %s1553_s20, %s15_s20   ;;  %s1509_s19 = sphi %s1551_s19, %s1715_s19   ;;  %s1505_s18 = sphi %s1549_s18, %s1714_s18  }
   0x3   : > { %p36_p1 = scmp.ge.s32.totalorder %s34_s21, 2  ;;  %p270_p2 = scmp.lt.s32.totalorder %s1513_s20, 3 }
   0x5   : > { %s1717_s21 = smov (%p36_p1, %s34_s21), 0  ;;  %p271_p3 = pnand %p1353_p0, %p270_p2 }
   0x6   : > { %p333_p4 = scmp.lt.s32.totalorder (!%p271_p3), %s1505_s18, 1  ;;  %vm391_vm0 = vcmask (!%p271_p3), 64512   ;;  %v1515_v0 = vmov (!%p271_p3), 0.0   ;;  %vm1516_vm1 = vmmov (!%p271_p3), 0   ;;  %vm382_vm2 = vcmask (!%p271_p3), 7168   ;;  %v412_v14 = vld [vmem:[%s1711_s3] sm:$0xff] (!%p271_p3) }
   0x7   : > { %274 = sbr.rel (%p271_p3) target bundleno = 830 (0x33e), region = 40  ;;  %1397 = vmatprep.subr.mxu0 (!%p271_p3), %v1515_v0  ;;  %392 = vst.msk [vmem:[#allocation4] sm:$0xff] (!%p271_p3), %vm391_vm0, %v1515_v0  ;;  %393 = vst.msk [vmem:[#allocation4 + $0x8] sm:$0xff] (!%p271_p3), %vm391_vm0, %v1515_v0  ;;  %1399 = vmatprep.mubr.msk.f32.mxu0 (!%p271_p3), %vm1516_vm1, %v1515_v0  ;;  %v1517_v13 = vmov (!%p271_p3), -1e+30   ;;  %v1518_v34 = vmov (!%p271_p3), 0  }
   0x8   : > { %394 = vst.msk [vmem:[#allocation4 + $0x10] sm:$0xff] (!%p271_p3), %vm391_vm0, %v1515_v0  ;;  %395 = vst.msk [vmem:[#allocation4 + $0x18] sm:$0xff] (!%p271_p3), %vm391_vm0, %v1515_v0  ;;  %1402 = vmatprep.subr.mxu1 (!%p271_p3), %v1515_v0  ;;  %1404 = vmatprep.mubr.msk.f32.mxu1 (!%p271_p3), %vm1516_vm1, %v1515_v0 }
   0x9   : > { %383 = vst.msk [vmem:[#allocation2] sm:$0xff] (!%p271_p3), %vm382_vm2, %v1517_v13  ;;  %384 = vst.msk [vmem:[#allocation2 + $0x8] sm:$0xff] (!%p271_p3), %vm382_vm2, %v1517_v13  ;;  %1465 = vset.pattern.permute.xlu0 (!%p271_p3), %v1518_v34  ;;  %1466 = vset.pattern.permute.xlu1 (!%p271_p3), %v1518_v34 }
   0xa   : > { %385 = vst.msk [vmem:[#allocation2 + $0x10] sm:$0xff] (!%p271_p3), %vm382_vm2, %v1517_v13  ;;  %386 = vst.msk [vmem:[#allocation2 + $0x18] sm:$0xff] (!%p271_p3), %vm382_vm2, %v1517_v13 }
   0xb   : > { %387 = vst.msk [vmem:[#allocation3] sm:$0xff] (!%p271_p3), %vm382_vm2, %v1515_v0  ;;  %388 = vst.msk [vmem:[#allocation3 + $0x8] sm:$0xff] (!%p271_p3), %vm382_vm2, %v1515_v0 }
   0xc   : > { %389 = vst.msk [vmem:[#allocation3 + $0x10] sm:$0xff] (!%p271_p3), %vm382_vm2, %v1515_v0  ;;  %390 = vst.msk [vmem:[#allocation3 + $0x18] sm:$0xff] (!%p271_p3), %vm382_vm2, %v1515_v0 }
   0xe   : > { %s1719_s18 = smov (!%p333_p4, %s1505_s18), 1 }
   0xf   : > { %s1584_s22 = sshll.u32 %s1719_s18, 5  ;;  %s369_s6 = scalar_lea.vmem %s1712_s4, %s1719_s18 }
  0x10   : > { %s348_s25 = scalar_lea.vmem %s1709_s1, %s1584_s22  ;;  %s340_s28 = scalar_lea.vmem %s1708_s0, %s1584_s22  ;;  %v1362_v15 = vld [vmem:[%s369_s6] ss:$0 sm:$0xff]  ;;  %v1642_v38 = vld [vmem:[#allocation2 + $0x8] sm:$0xff] }
  0x11   : > { %v404_v1 = vld [vmem:[%s348_s25] sm:$0xff]  ;;  %v405_v3 = vld [vmem:[%s348_s25 + $0x8] sm:$0xff]  ;;  %v398_v6 = vld [vmem:[%s340_s28 + $0x10] sm:$0xff]  ;;  %v420_v16 = vadd.f32 %v1362_v15, %v412_v14  ;;  %s356_s11 = scalar_lea.vmem %s1710_s2, %s1584_s22  ;;  %s377_s14 = scalar_lea.vmem %s1713_s5, %s1584_s22 }
  0x12   : > { %v396_v2 = vld [vmem:[%s340_s28] sm:$0xff]  ;;  %1398 = vmatpush3.xpose.msk.msra.mxu0 %vm391_vm0, %v404_v1  ;;  %1403 = vmatpush3.xpose.msk.msra.mxu1 %vm391_vm0, %v405_v3  ;;  %v397_v5 = vld [vmem:[%s340_s28 + $0x8] sm:$0xff]  ;;  %v406_v8 = vld [vmem:[%s348_s25 + $0x10] sm:$0xff]  ;;  %v402_v11 = vmul.f32 0.35355338, %v398_v6 }
  0x13   : > { %v400_v4 = vmul.f32 0.35355338, %v396_v2  ;;  %v401_v7 = vmul.f32 0.35355338, %v397_v5  ;;  %1407 = vmatprep.subr.mxu0 %v1515_v0  ;;  %1412 = vmatprep.subr.mxu1 %v1515_v0  ;;  %v399_v9 = vld [vmem:[%s340_s28 + $0x18] sm:$0xff]  ;;  %v1637_v35 = vld [vmem:[#allocation2] sm:$0xff] }
  0x14   : > { %v407_v10 = vld [vmem:[%s348_s25 + $0x18] sm:$0xff]  ;;  %v403_v12 = vmul.f32 0.35355338, %v399_v9  ;;  %v421_v17 = vmax.f32 %v420_v16, -1e+09  ;;  %v1644_v39 = vld [vmem:[#allocation2 + $0x10] sm:$0xff] }
  0x15   : > { %1400 = vmatmul.mubr.msk.f32.vlgmr.msra.gmra.mrb[0].mxu0 %vm391_vm0, %v400_v4  ;;  %1405 = vmatmul.mubr.msk.f32.vlgmr.msra.gmra.mrb[0].mxu1 %vm391_vm0, %v401_v7  ;;  %v1653_v45 = vld [vmem:[#allocation2 + $0x18] sm:$0xff]  ;;  %v408_v51 = vld [vmem:[%s356_s11] sm:$0xff]  ;;  %v409_v52 = vld [vmem:[%s356_s11 + $0x8] sm:$0xff] }
  0x16   : > { %1408 = vmatpush3.xpose.msk.msra.mxu0 %vm391_vm0, %v406_v8  ;;  %1409 = vmatprep.mubr.msk.f32.mxu0 %vm1516_vm1, %v1515_v0  ;;  %v410_v1 = vld [vmem:[%s356_s11 + $0x10] sm:$0xff]  ;;  %v411_v5 = vld [vmem:[%s356_s11 + $0x18] sm:$0xff] }
  0x17   : > { %1413 = vmatpush3.xpose.msk.msra.mxu1 %vm391_vm0, %v407_v10  ;;  %1414 = vmatprep.mubr.msk.f32.mxu1 %vm1516_vm1, %v1515_v0 }
  0x18   : > { %1417 = vmatprep.subr.mxu0 %v1515_v0  ;;  %1422 = vmatprep.subr.mxu1 %v1515_v0 }
  0x19   : > { %1410 = vmatmul.mubr.msk.f32.vlgmr.msra.gmra.mrb[2].mxu0 %vm391_vm0, %v402_v11 }
  0x1a   : > { %1415 = vmatmul.mubr.msk.f32.vlgmr.msra.gmra.mrb[2].mxu1 %vm391_vm0, %v403_v12  ;;  %1419 = vmatprep.mubr.msk.f32.mxu0 %vm1516_vm1, %v1515_v0 }
  0x1b   : > { %1424 = vmatprep.mubr.msk.f32.mxu1 %vm1516_vm1, %v1515_v0  ;;  %1418 = vmatpush3.msra.mxu0 %v408_v51 }
  0x1c   : > { %1427 = vmatprep.subr.mxu0 %v1515_v0  ;;  %1423 = vmatpush3.msra.mxu1 %v409_v52 }
  0x1d   : > { %1432 = vmatprep.subr.mxu1 %v1515_v0 }
  0xe8   : > { %v495_v18 = vpop.f32.mrb[0].mxu0  ;;  %v571_v19 = vpop.f32.mrb[0].mxu1 }
  0xe9   : > { %v496_v20 = vadd.f32 %v495_v18, %v421_v17  ;;  %v1401_v21 = vpop.f32.mrb[1].mxu0  ;;  %v572_v22 = vadd.f32 %v571_v19, %v421_v17  ;;  %v1406_v23 = vpop.f32.mrb[1].mxu1  ;;  %v791_v19 = vld [vmem:[#allocation3] sm:$0xff] }
  0xeb   : > { %v731_v24 = vsel %vm391_vm0, %v496_v20, -inf  ;;  %v734_v27 = vsel %vm391_vm0, %v572_v22, -inf }
  0xec   : > { %732 = vmax.xlane.f32.xlu0 %v731_v24  ;;  %v647_v25 = vpop.f32.mrb[2].mxu0 }
  0xed   : > { %v648_v26 = vadd.f32 %v647_v25, %v421_v17  ;;  %v1411_v28 = vpop.f32.mrb[3].mxu0  ;;  %v723_v29 = vpop.f32.mrb[2].mxu1 }
  0xee   : > { %v724_v30 = vadd.f32 %v723_v29, %v421_v17  ;;  %v1416_v31 = vpop.f32.mrb[3].mxu1 }
  0xef   : > { %v737_v32 = vsel %vm391_vm0, %v648_v26, -inf }
  0xf0   : > { %735 = vmax.xlane.f32.xlu0 %v734_v27  ;;  %738 = vmax.xlane.f32.xlu1 %v737_v32  ;;  %v740_v33 = vsel %vm391_vm0, %v724_v30, -inf }
  0xf4   : > { %741 = vmax.xlane.f32.xlu1 %v740_v33 }
 0x179   : > { %v733_v36 = vpop.xlane.xlu0 %732 }
 0x17a   : > { %v1640_v37 = vmax.f32 %v1637_v35, %v733_v36 }
 0x17c   : > { %v747_v40 = vsub.f32 %v1637_v35, %v1640_v37  ;;  %1148 = vst.msk [vmem:[#allocation2] sm:$0xff] %vm382_vm2, %v1640_v37  ;;  %761 = vperm.xlu0 %1465, %v1640_v37  }
 0x17d   : > { %v736_v41 = vpop.xlane.xlu0 %735  ;;  %v739_v42 = vpop.xlane.xlu1 %738 }
 0x17e   : > { %v744_v43 = vmax.f32 %v1642_v38, %v736_v41  ;;  %v745_v44 = vmax.f32 %v1644_v39, %v739_v42  ;;  %v751_v13 = vmul.f32 1.442695, %v747_v40 }
 0x180   : > { %v748_v46 = vsub.f32 %v1642_v38, %v744_v43  ;;  %1149 = vst.msk [vmem:[#allocation2 + $0x8] sm:$0xff] %vm382_vm2, %v744_v43  ;;  %766 = vperm.xlu1 %1466, %v744_v43   ;;  %v749_v47 = vsub.f32 %v1644_v39, %v745_v44  ;;  %1150 = vst.msk [vmem:[#allocation2 + $0x10] sm:$0xff] %vm382_vm2, %v745_v44  ;;  %v820_v43 = vld [vmem:[#allocation4] sm:$0xff] }
 0x181   : > { %v742_v48 = vpop.xlane.xlu1 %741 }
 0x182   : > { %v746_v49 = vmax.f32 %v1653_v45, %v742_v48  ;;  %v753_v11 = vmul.f32 1.442695, %v748_v46  ;;  %v821_v46 = vld [vmem:[#allocation4 + $0x8] sm:$0xff] }
 0x184   : > { %771 = vperm.xlu1 %1466, %v745_v44   ;;  %v750_v50 = vsub.f32 %v1653_v45, %v746_v49  ;;  %1151 = vst.msk [vmem:[#allocation2 + $0x18] sm:$0xff] %vm382_vm2, %v746_v49 }
 0x186   : > { %v757_v14 = vmul.f32 1.442695, %v750_v50 }
 0x188   : > { %776 = vperm.xlu1 %1466, %v746_v49  }
 0x1fb   : > { %v762_v53 = vpop.permute.xlu0 %761 }
 0x1fc   : > { %v779_v54 = vsub.f32 %v496_v20, %v762_v53  ;;  %v822_v53 = vld [vmem:[#allocation4 + $0x10] sm:$0xff] }
 0x1fe   : > { %v783_v55 = vmul.f32 1.442695, %v779_v54 }
 0x1ff   : > { %v767_v56 = vpop.permute.xlu1 %766 }
 0x200   : > { %1467 = vpow2.f32 %v783_v55  ;;  %v780_v57 = vsub.f32 %v572_v22, %v767_v56  ;;  %v792_v22 = vld [vmem:[#allocation3 + $0x8] sm:$0xff] }
 0x202   : > { %v785_v58 = vmul.f32 1.442695, %v780_v57 }
 0x203   : > { %v772_v59 = vpop.permute.xlu1 %771 }
 0x204   : > { %1469 = vpow2.f32 %v785_v58  ;;  %v781_v60 = vsub.f32 %v648_v26, %v772_v59  ;;  %v793_v26 = vld [vmem:[#allocation3 + $0x10] sm:$0xff]  ;;  %v823_v58 = vld [vmem:[#allocation4 + $0x18] sm:$0xff] }
 0x206   : > { %v787_v61 = vmul.f32 1.442695, %v781_v60 }
 0x207   : > { %v777_v62 = vpop.permute.xlu1 %776 }
 0x208   : > { %1471 = vpow2.f32 %v787_v61  ;;  %v782_v63 = vsub.f32 %v724_v30, %v777_v62  ;;  %v794_v30 = vld [vmem:[#allocation3 + $0x18] sm:$0xff] }
 0x20a   : > { %v1468_v2 = vpop.eup %1467  ;;  %v789_v3 = vmul.f32 1.442695, %v782_v63 }
 0x20b   : > { %1420 = vmatmul.mubr.msk.f32.vlgmr.msra.gmra.mrb[4].mxu0 %vm391_vm0, %v1468_v2  ;;  %v799_v4 = vsel %vm391_vm0, %v1468_v2, 0.0 }
 0x20c   : > { %1473 = vpow2.f32 %v789_v3  ;;  %800 = vadd.xlane.f32.xlu1 %v799_v4  ;;  %1428 = vmatpush3.msra.mxu0 %v410_v1 }
 0x20d   : > { %1429 = vmatprep.mubr.msk.f32.mxu0 %vm1516_vm1, %v1515_v0  ;;  %1475 = vpow2.f32 %v753_v11 }
 0x20e   : > { %v1470_v6 = vpop.eup %1469  ;;  %1477 = vpow2.f32 %v751_v13 }
 0x20f   : > { %1425 = vmatmul.mubr.msk.f32.vlgmr.msra.gmra.mrb[4].mxu1 %vm391_vm0, %v1470_v6  ;;  %v802_v7 = vsel %vm391_vm0, %v1470_v6, 0.0 }
 0x210   : > { %803 = vadd.xlane.f32.xlu0 %v802_v7  ;;  %1433 = vmatpush3.msra.mxu1 %v411_v5 }
 0x211   : > { %1434 = vmatprep.mubr.msk.f32.mxu1 %vm1516_vm1, %v1515_v0  ;;  %v755_v0 = vmul.f32 1.442695, %v749_v47 }
 0x212   : > { %v1472_v8 = vpop.eup %1471 }
 0x213   : > { %1430 = vmatmul.mubr.msk.f32.vlgmr.msra.gmra.mrb[6].mxu0 %vm391_vm0, %v1472_v8  ;;  %v805_v9 = vsel %vm391_vm0, %v1472_v8, 0.0  ;;  %1479 = vpow2.f32 %v755_v0 }
 0x214   : > { %806 = vadd.xlane.f32.xlu1 %v805_v9  ;;  %1481 = vpow2.f32 %v757_v14 }
 0x216   : > { %v1474_v10 = vpop.eup %1473 }
 0x217   : > { %1435 = vmatmul.mubr.msk.f32.vlgmr.msra.gmra.mrb[6].mxu1 %vm391_vm0, %v1474_v10  ;;  %v808_v12 = vsel %vm391_vm0, %v1474_v10, 0.0  ;;  %v1476_v15 = vpop.eup %1475 }
 0x218   : > { %809 = vadd.xlane.f32.xlu1 %v808_v12  ;;  %v1478_v16 = vpop.eup %1477  ;;  %v796_v24 = vmul.f32 %v1476_v15, %v792_v22 }
 0x219   : > { %v795_v20 = vmul.f32 %v1478_v16, %v791_v19 }
 0x21d   : > { %v1480_v17 = vpop.eup %1479 }
 0x21e   : > { %v1482_v18 = vpop.eup %1481  ;;  %v797_v28 = vmul.f32 %v1480_v17, %v793_v26 }
 0x21f   : > { %v798_v33 = vmul.f32 %v1482_v18, %v794_v30 }
 0x226   : > { %831 = vperm.xlu0 %1465, %v1476_v15  }
 0x229   : > { %826 = vperm.xlu1 %1466, %v1478_v16  }
 0x22d   : > { %836 = vperm.xlu1 %1466, %v1480_v17  }
 0x231   : > { %841 = vperm.xlu1 %1466, %v1482_v18  }
 0x299   : > { %v801_v21 = vpop.xlane.xlu1 %800 }
 0x29a   : > { %v811_v23 = vadd.f32 %v801_v21, %v795_v20 }
 0x29c   : > { %816 = vst.msk [vmem:[#allocation3] sm:$0xff] %vm382_vm2, %v811_v23 }
 0x29d   : > { %v804_v25 = vpop.xlane.xlu0 %803 }
 0x29e   : > { %v812_v27 = vadd.f32 %v804_v25, %v796_v24 }
 0x2a0   : > { %817 = vst.msk [vmem:[#allocation3 + $0x8] sm:$0xff] %vm382_vm2, %v812_v27 }
 0x2a1   : > { %v807_v29 = vpop.xlane.xlu1 %806 }
 0x2a2   : > { %v813_v31 = vadd.f32 %v807_v29, %v797_v28 }
 0x2a3   : > { %v1159_v32 = vld [vmem:[#allocation3] sm:$0xff] }
 0x2a4   : > { %818 = vst.msk [vmem:[#allocation3 + $0x10] sm:$0xff] %vm382_vm2, %v813_v31  ;;  %1483 = vrcp.f32 %v1159_v32 }
 0x2a5   : > { %v810_v34 = vpop.xlane.xlu1 %809  ;;  %v832_v47 = vpop.permute.xlu0 %831 }
 0x2a6   : > { %v814_v35 = vadd.f32 %v810_v34, %v798_v33  ;;  %v845_v52 = vmul.f32 %v832_v47, %v821_v46 }
 0x2a7   : > { %v1160_v36 = vld [vmem:[#allocation3 + $0x8] sm:$0xff] }
 0x2a8   : > { %819 = vst.msk [vmem:[#allocation3 + $0x18] sm:$0xff] %vm382_vm2, %v814_v35  ;;  %1485 = vrcp.f32 %v1160_v36 }
 0x2a9   : > { %v827_v44 = vpop.permute.xlu1 %826 }
 0x2aa   : > { %v844_v45 = vmul.f32 %v827_v44, %v820_v43 }
 0x2ab   : > { %v1161_v37 = vld [vmem:[#allocation3 + $0x10] sm:$0xff] }
 0x2ac   : > { %1487 = vrcp.f32 %v1161_v37 }
 0x2ad   : > { %v837_v51 = vpop.permute.xlu1 %836 }
 0x2ae   : > { %v1484_v38 = vpop.eup %1483  ;;  %v846_v57 = vmul.f32 %v837_v51, %v822_v53 }
 0x2af   : > { %1169 = vperm.xlu1 %1466, %v1484_v38   ;;  %v1162_v39 = vld [vmem:[#allocation3 + $0x18] sm:$0xff] }
 0x2b0   : > { %1489 = vrcp.f32 %v1162_v39 }
 0x2b1   : > { %v842_v59 = vpop.permute.xlu1 %841 }
 0x2b2   : > { %v1486_v40 = vpop.eup %1485  ;;  %v847_v63 = vmul.f32 %v842_v59, %v823_v58 }
 0x2b3   : > { %1174 = vperm.xlu0 %1465, %v1486_v40  }
 0x2b6   : > { %v1488_v41 = vpop.eup %1487 }
 0x2b7   : > { %1179 = vperm.xlu1 %1466, %v1488_v41  }
 0x2ba   : > { %v1490_v42 = vpop.eup %1489 }
 0x2bb   : > { %1184 = vperm.xlu0 %1465, %v1490_v42  }
 0x2de   : > { %v917_v48 = vpop.f32.mrb[4].mxu0 }
 0x2df   : > { %v1140_v49 = vadd.f32 %v917_v48, %v844_v45  ;;  %v1421_v50 = vpop.f32.mrb[5].mxu0 }
 0x2e1   : > { %1144 = vst.msk [vmem:[#allocation4] sm:$0xff] %vm391_vm0, %v1140_v49 }
 0x2e2   : > { %v990_v54 = vpop.f32.mrb[4].mxu1 }
 0x2e3   : > { %v1141_v55 = vadd.f32 %v990_v54, %v845_v52  ;;  %v1426_v56 = vpop.f32.mrb[5].mxu1 }
 0x2e5   : > { %1145 = vst.msk [vmem:[#allocation4 + $0x8] sm:$0xff] %vm391_vm0, %v1141_v55 }
 0x2e6   : > { %v1063_v60 = vpop.f32.mrb[6].mxu0 }
 0x2e7   : > { %v1142_v61 = vadd.f32 %v1063_v60, %v846_v57  ;;  %v1431_v62 = vpop.f32.mrb[7].mxu0 }
 0x2e8   : > { %v1155_v5 = vld [vmem:[#allocation4] sm:$0xff] }
 0x2e9   : > { %1146 = vst.msk [vmem:[#allocation4 + $0x10] sm:$0xff] %vm391_vm0, %v1142_v61 }
 0x2ea   : > { %v1136_v1 = vpop.f32.mrb[6].mxu1 }
 0x2eb   : > { %v1143_v2 = vadd.f32 %v1136_v1, %v847_v63  ;;  %v1436_v3 = vpop.f32.mrb[7].mxu1 }
 0x2ec   : > { %v1156_v7 = vld [vmem:[#allocation4 + $0x8] sm:$0xff] }
 0x2ed   : > { %1147 = vst.msk [vmem:[#allocation4 + $0x18] sm:$0xff] %vm391_vm0, %v1143_v2 }
 0x2f0   : > { %v1157_v11 = vld [vmem:[#allocation4 + $0x10] sm:$0xff] }
 0x2f4   : > { %v1158_v0 = vld [vmem:[#allocation4 + $0x18] sm:$0xff] }
 0x32e   : > { %v1170_v4 = vpop.permute.xlu1 %1169 }
 0x32f   : > { %v1187_v6 = vmul.f32 %v1170_v4, %v1155_v5 }
 0x331   : > { %1191 = vst.msk [vmem:[%s377_s14] sm:$0xff] %vm391_vm0, %v1187_v6 }
 0x332   : > { %v1175_v8 = vpop.permute.xlu0 %1174 }
 0x333   : > { %v1188_v9 = vmul.f32 %v1175_v8, %v1156_v7 }
 0x335   : > { %1192 = vst.msk [vmem:[%s377_s14 + $0x8] sm:$0xff] %vm391_vm0, %v1188_v9 }
 0x336   : > { %v1180_v10 = vpop.permute.xlu1 %1179 }
 0x337   : > { %v1189_v12 = vmul.f32 %v1180_v10, %v1157_v11 }
 0x339   : > { %1193 = vst.msk [vmem:[%s377_s14 + $0x10] sm:$0xff] %vm391_vm0, %v1189_v12 }
 0x33a   : > { %v1185_v13 = vpop.permute.xlu0 %1184 }
 0x33b   : > { %v1190_v14 = vmul.f32 %v1185_v13, %v1158_v0 }
 0x33d   : > { %1194 = vst.msk [vmem:[%s377_s14 + $0x18] sm:$0xff] %vm391_vm0, %v1190_v14 }
 0x33e PF: > { %s15_s20 = sadd.s32 1, %s1513_s20   ;;  %s1714_s18 = smov %s1509_s19 }
 0x33f   : > { %p12_p5 = scmp.ge.s32.totalorder %s15_s20, 4   ;;  %s1715_s19 = smov %s1717_s21 }
 0x341   :  { %14 = sbr.rel (!%p12_p5) target bundleno = 2 (0x2), region = 90 }

// kernel: transformer_decoder_layer.15
= control target key start
LH: loop header
LB: loop body
LE: loop exit
PB: predicated region body
PF: predicated region fallthrough
CT: control target
= control target key end

     0   :  { %v168_v0 = vmov 0.0|0.0   ;;  %vm169_vm0 = vmmov 0   ;;  %v170_v6 = vmov 0.0   ;;  %vm28_vm1 = vcmask 261120   ;;  %s227_s1 = inlined_call_operand.vmem [shape: f32[32,64], index: 1, kind: input, shape index: {}]   ;;  %s228_s0 = inlined_call_operand.vmem [shape: f32[20,32], index: 0, kind: input, shape index: {}]   ;;  %s229_s2 = inlined_call_operand.vmem [shape: f32[1,64], index: 2, kind: input, shape index: {}]   ;;  %s230_s3 = inlined_call_operand.vmem [shape: f32[20,64], index: 3, kind: output, shape index: {}]  }
   0x1   :  { %161 = vmatprep.subr.bf16.mxu1 %v168_v0  ;;  %v17_v1 = vld [vmem:[%s227_s1] sm:$0xff]  ;;  %v18_v2 = vld [vmem:[%s227_s1 + $0x8] sm:$0xff]  ;;  %155 = vmatprep.subr.bf16.mxu0 %v168_v0  ;;  %v19_v3 = vld [vmem:[%s227_s1 + $0x10] sm:$0xff]  ;;  %vm118_vm2 = vcmask 523264   ;;  %vm121_vm3 = vcmask 519168  }
   0x2   :  { %v156_v4 = vpack.c.bf16 %v18_v2, %v17_v1  ;;  %v20_v5 = vld [vmem:[%s227_s1 + $0x18] sm:$0xff]  ;;  %149 = vmatprep.mubr.msk.f32.mxu1 %vm169_vm0, %v170_v6  ;;  %146 = vmatprep.mubr.msk.f32.mxu0 %vm169_vm0, %v170_v6  ;;  %v15_v8 = vld [vmem:[%s228_s0 + $0x8] sm:$0xff]  ;;  %v14_v9 = vld [vmem:[%s228_s0] sm:$0xff] }
   0x3   :  { %v159_v7 = vpack.c.bf16 %v20_v5, %v19_v3  ;;  %v16_v10 = vld [vmem:[%s228_s0 + $0x10] sm:$0xf]  ;;  %v127_v11 = vld [vmem:[%s229_s2] ss:$0 sm:$0xff] }
   0x4   :  { %163 = vmatpush3.bf16.msra.mxu1 %v156_v4  ;;  %157 = vmatpush3.bf16.msra.mxu0 %v156_v4 }
   0x5   :  { %162 = vmatprep.subr.bf16.mxu1 %v168_v0  ;;  %158 = vmatprep.subr.bf16.mxu0 %v168_v0 }
   0x8   :  { %164 = vmatpush3.bf16.msra.mxu1 %v159_v7  ;;  %160 = vmatpush3.bf16.msra.mxu0 %v159_v7 }
   0xb   :  { %150 = vmatmul.mubr.msk.f32.vlgmr.msra.gmra.mrb[0].mxu1 %vm28_vm1, %v15_v8  ;;  %147 = vmatmul.mubr.msk.f32.vlgmr.msra.gmra.mrb[0].mxu0 %vm28_vm1, %v14_v9 }
   0xc   :  { %152 = vmatprep.mubr.msk.f32.mxu1 %vm169_vm0, %v170_v6 }
   0xf   :  { %153 = vmatmul.mubr.msk.f32.gmra.mrb[2].mxu1 %vm28_vm1, %v16_v10 }
  0xde   :  { %v109_v12 = vpop.f32.mrb[0].mxu1  ;;  %v104_v13 = vpop.f32.mrb[0].mxu0 }
  0xdf   :  { %v110_v14 = vadd.f32 %v127_v11, %v109_v12  ;;  %v151_v15 = vpop.f32.mrb[1].mxu1  ;;  %v105_v16 = vadd.f32 %v127_v11, %v104_v13  ;;  %v148_v17 = vpop.f32.mrb[1].mxu0 }
  0xe1   :  { %120 = vst.msk [vmem:[%s230_s3 + $0x8] sm:$0xff] %vm118_vm2, %v110_v14  ;;  %119 = vst.msk [vmem:[%s230_s3] sm:$0xff] %vm118_vm2, %v105_v16 }
  0xe2   :  { %v114_v18 = vpop.f32.mrb[2].mxu1 }
  0xe3   :  { %v115_v19 = vadd.f32 %v127_v11, %v114_v18  ;;  %v154_v20 = vpop.f32.mrb[3].mxu1 }
  0xe5   :  { %122 = vst.msk [vmem:[%s230_s3 + $0x10] sm:$0xf] %vm121_vm3, %v115_v19 }

// kernel: transformer_decoder_layer.19
= control target key start
LH: loop header
LB: loop body
LE: loop exit
PB: predicated region body
PF: predicated region fallthrough
CT: control target
= control target key end

     0   :  { %vm34_vm0 = vcmask 261120   ;;  %s554_s0 = inlined_call_operand.vmem [shape: f32[16,32], index: 0, kind: input, shape index: {}, may-alias: {0,5}]   ;;  %s555_s1 = inlined_call_operand.vmem [shape: f32[32,64], index: 1, kind: input, shape index: {}]   ;;  %s556_s2 = inlined_call_operand.vmem [shape: f32[1,64], index: 2, kind: input, shape index: {}]   ;;  %s557_s3 = inlined_call_operand.vmem [shape: f32[64,32], index: 3, kind: input, shape index: {}]   ;;  %s558_s4 = inlined_call_operand.vmem [shape: f32[1,32], index: 4, kind: input, shape index: {}]   ;;  %s559_s5 = inlined_call_operand.vmem [shape: f32[16,32], index: 5, kind: input, shape index: {}, may-alias: {0,5}]   ;;  %s560_s6 = inlined_call_operand.vmem [shape: f32[1,32], index: 6, kind: input, shape index: {}]   ;;  %s561_s7 = inlined_call_operand.vmem [shape: f32[1,32], index: 7, kind: input, shape index: {}]   ;;  %s562_s8 = inlined_call_operand.hbm [shape: f32[16,32], index: 8, kind: output, shape index: {}]  }
   0x1   :  { %v39_v0 = vld [vmem:[%s555_s1] sm:$0xff]  ;;  %v40_v1 = vld [vmem:[%s555_s1 + $0x8] sm:$0xff]  ;;  %v41_v2 = vld [vmem:[%s555_s1 + $0x10] sm:$0xff] }
   0x2   :  { %v365_v3 = vpack.c.bf16 %v40_v1, %v39_v0  ;;  %v42_v4 = vld [vmem:[%s555_s1 + $0x18] sm:$0xff]  ;;  %v37_v5 = vld [vmem:[%s554_s0] sm:$0xff]  ;;  %v137_v8 = vld [vmem:[%s557_s3 + $0x8] sm:$0xff] }
   0x3   :  { %v369_v6 = vpack.c.bf16 %v42_v4, %v41_v2  ;;  %343 = vmatprep.mubr.msk.f32.mxu0 %vm34_vm0, %v37_v5  ;;  %v136_v7 = vld [vmem:[%s557_s3] sm:$0xff]  ;;  %v138_v9 = vld [vmem:[%s557_s3 + $0x10] sm:$0xff]  ;;  %v139_v11 = vld [vmem:[%s557_s3 + $0x18] sm:$0xff] }
   0x4   :  { %366 = vmatprep.subr.bf16.mxu0 %v365_v3  ;;  %v373_v10 = vpack.c.bf16 %v137_v8, %v136_v7  ;;  %v377_v12 = vpack.c.bf16 %v139_v11, %v138_v9  ;;  %v140_v13 = vld [vmem:[%s557_s3 + $0x20] sm:$0xff]  ;;  %v141_v14 = vld [vmem:[%s557_s3 + $0x28] sm:$0xff] }
   0x5   :  { %368 = vmatpush3.bf16.msra.mxu0 %v365_v3 }
   0x6   :  { %13 = vsyncpa [#allocation4], 0  ;;  %370 = vmatprep.subr.bf16.mxu0 %v369_v6  ;;  %374 = vmatprep.subr.bf16.mxu1 %v373_v10  ;;  %v381_v15 = vpack.c.bf16 %v141_v14, %v140_v13  ;;  %v38_v16 = vld [vmem:[%s554_s0 + $0x8] sm:$0xff]  ;;  %v142_v17 = vld [vmem:[%s557_s3 + $0x30] sm:$0xff]  ;;  %v421_v20 = vmov 0.0   ;;  %vm144_vm1 = vcmask 523264  }
   0x7   :  { %376 = vmatpush3.bf16.msra.mxu1 %v373_v10  ;;  %v143_v18 = vld [vmem:[%s557_s3 + $0x38] sm:$0xff]  ;;  %36 = vst.msk [vmem:[#allocation2 + $0x8] sm:$0xff] %vm34_vm0, %v421_v20  ;;  %35 = vst.msk [vmem:[#allocation2] sm:$0xff] %vm34_vm0, %v421_v20  ;;  %v311_v21 = vld [vmem:[%s556_s2] ss:$0 sm:$0xff]  ;;  %s422_s17 = smov [#allocation3]  }
   0x8   :  { %378 = vmatprep.subr.bf16.mxu1 %v377_v12  ;;  %v385_v19 = vpack.c.bf16 %v143_v18, %v142_v17  ;;  %v316_v34 = vld [vmem:[%s558_s4] ss:$0 sm:$0xff]  ;;  %v245_v40 = vld [vmem:[%s559_s5 + $0x8] sm:$0xff]  ;;  %s300_s18 = sshll.u32 %s422_s17, 4  ;;  %s301_s18 = int_to_ptr.vmem [resolvable:$true] %s300_s18 }
   0x9   :  { %372 = vmatpush3.bf16.msra.mxu0 %v369_v6  ;;  %v244_v37 = vld [vmem:[%s559_s5] sm:$0xff]  ;;  %s397_s19 = scalar_lea.vmem %s301_s18, 256  ;;  %p402_p1 = scmp.lt.s32.totalorder %s301_s18, %s301_s18 }
   0xa   :  { %v317_v62 = vld [vmem:[%s560_s6] ss:$0 sm:$0xff]  ;;  %p398_p0 = scmp.ne.s32.totalorder %s301_s18, %s397_s19  ;;  %p403_p2 = scmp.lt.s32.totalorder %s397_s19, %s397_s19 }
   0xb   :  { %380 = vmatpush3.bf16.msra.mxu1 %v377_v12  ;;  %v318_v0 = vld [vmem:[%s561_s7] ss:$0 sm:$0xff] }
   0xc   :  { %344 = vmatmul.mubr.msk.f32.vlgmr.msra.gmra.mrb[0].mxu0 %vm34_vm0, %v38_v16  ;;  %382 = vmatprep.subr.bf16.mxu1 %v381_v15  ;;  %p404_p3 = por %p403_p2, %p402_p1 }
   0xe   :  { %v135_v28 = vld [vmem:[#allocation2 + $0x8] sm:$0xff]  ;;  %v134_v29 = vld [vmem:[#allocation2] sm:$0xff]  ;;  %p405_p4 = pnand %p404_p3, %p398_p0 }
   0xf   :  { %384 = vmatpush3.bf16.msra.mxu1 %v381_v15 }
  0x10   :  { %386 = vmatprep.subr.bf16.mxu1 %v385_v19 }
  0x13   :  { %388 = vmatpush3.bf16.msra.mxu1 %v385_v19 }
  0xdf   :  { %v345_v22 = vpop.f32.mrb[0].mxu0 }
  0xe0   :  { %v129_v23 = vadd.f32 %v345_v22, %v311_v21  ;;  %v123_v24 = vpop.f32.mrb[1].mxu0 }
  0xe1   :  { %v124_v25 = vadd.f32 %v311_v21, %v123_v24 }
  0xe2   :  { %v133_v27 = vmax.f32 %v129_v23, 0.0 }
  0xe3   :  { %v132_v26 = vmax.f32 %v124_v25, 0.0 }
  0xe5   :  { %362 = vmatprep.mubr.msk.f32.mxu1 %vm144_vm1, %v132_v26 }
  0xe6   :  { %363 = vmatmul.mubr.msk.f32.vlgmr.msra.gmra.mrb[0].mxu1 %vm144_vm1, %v133_v27 }
 0x1b9   :  { %v364_v30 = vpop.f32.mrb[0].mxu1 }
 0x1ba   :  { %v227_v31 = vadd.f32 %v364_v30, %v135_v28  ;;  %v217_v32 = vpop.f32.mrb[1].mxu1 }
 0x1bb   :  { %v226_v33 = vadd.f32 %v217_v32, %v134_v29 }
 0x1bc   :  { %229 = vst.msk [vmem:[#allocation2 + $0x8] sm:$0xff] %vm34_vm0, %v227_v31 }
 0x1bd   :  { %228 = vst.msk [vmem:[#allocation2] sm:$0xff] %vm34_vm0, %v226_v33 }
 0x1c3   :  { %v234_v35 = vld [vmem:[#allocation2 + $0x8] sm:$0xff] }
 0x1c4   :  { %v233_v36 = vld [vmem:[#allocation2] sm:$0xff]  ;;  %v243_v39 = vadd.f32 %v316_v34, %v234_v35 }
 0x1c5   :  { %v242_v38 = vadd.f32 %v316_v34, %v233_v36 }
 0x1c6   :  { %v247_v43 = vadd.f32 %v245_v40, %v243_v39 }
 0x1c7   :  { %v246_v41 = vadd.f32 %v244_v37, %v242_v38 }
 0x1c8   :  { %v251_v44 = vsel %vm34_vm0, %v247_v43, 0.0 }
 0x1c9   :  { %v248_v42 = vsel %vm34_vm0, %v246_v41, 0.0 }
 0x1ca   :  { %249 = vadd.xlane.f32.xlu0 %v248_v42 }
 0x1ce   :  { %252 = vadd.xlane.f32.xlu0 %v251_v44 }
 0x257   :  { %v250_v45 = vpop.xlane.xlu0 %249 }
 0x258   :  { %v255_v46 = vmul.f32 0.03125, %v250_v45 }
 0x25a   :  { %v257_v47 = vsub.f32 %v246_v41, %v255_v46 }
 0x25b   :  { %v253_v48 = vpop.xlane.xlu0 %252 }
 0x25c   :  { %v256_v49 = vmul.f32 0.03125, %v253_v48  ;;  %v259_v50 = vmul.f32 %v257_v47, %v257_v47 }
 0x25e   :  { %v258_v51 = vsub.f32 %v247_v43, %v256_v49  ;;  %v261_v52 = vsel %vm34_vm0, %v259_v50, 0.0 }
 0x25f   :  { %262 = vadd.xlane.f32.xlu1 %v261_v52 }
 0x260   :  { %v260_v53 = vmul.f32 %v258_v51, %v258_v51 }
 0x262   :  { %v264_v54 = vsel %vm34_vm0, %v260_v53, 0.0 }
 0x263   :  { %265 = vadd.xlane.f32.xlu1 %v264_v54 }
 0x2ec   :  { %v263_v55 = vpop.xlane.xlu1 %262 }
 0x2ed   :  { %v267_v56 = vmul.f32 0.03125, %v263_v55 }
 0x2ef   :  { %v269_v57 = vadd.f32 1e-05, %v267_v56 }
 0x2f0   :  { %v266_v58 = vpop.xlane.xlu1 %265 }
 0x2f1   :  { %393 = vrsqrt.f32 %v269_v57  ;;  %v268_v59 = vmul.f32 0.03125, %v266_v58 }
 0x2f3   :  { %v270_v60 = vadd.f32 1e-05, %v268_v59 }
 0x2f5   :  { %395 = vrsqrt.f32 %v270_v60 }
 0x2fb   :  { %v394_v61 = vpop.eup %393 }
 0x2fc   :  { %v273_v63 = vmul.f32 %v394_v61, %v257_v47 }
 0x2fe   :  { %v282_v1 = vmul.f32 %v317_v62, %v273_v63 }
 0x2ff   :  { %v396_v2 = vpop.eup %395 }
 0x300   :  { %v274_v3 = vmul.f32 %v396_v2, %v258_v51  ;;  %v291_v4 = vadd.f32 %v318_v0, %v282_v1 }
 0x302   :  { %v283_v5 = vmul.f32 %v317_v62, %v274_v3  ;;  %293 = vst.msk [vmem:[#allocation3] sm:$0xff] %vm34_vm0, %v291_v4 }
 0x304   :  { %v292_v6 = vadd.f32 %v318_v0, %v283_v5 }
 0x306   :  { %294 = vst.msk [vmem:[#allocation3 + $0x8] sm:$0xff] %vm34_vm0, %v292_v6 }
 0x307   :  { %408 = shalt.err (!%p405_p4)
}
 0x308   :  { %s409_s20 = scalar_lea.hbm %s562_s8, 256 }
 0x309   :  { %p410_p5 = scmp.ne.s32.totalorder %s562_s8, %s409_s20  ;;  %p413_p6 = scmp.lt.u32.totalorder %s409_s20, %s562_s8 }
 0x30b   :  { %p415_p7 = pnand %p413_p6, %p410_p5 }
 0x30d   :  { %418 = shalt.err (!%p415_p7)
}
 0x30e   :  { %s423_s24 = smov 128   ;;  %s424_s25 = smov 8  }
 0x30f   :  { %306 = dma.vmem_to_hbm [thread:$0]  %s301_s18, 256, %s562_s8, [#allocation4], %s423_s24, %s423_s24, %s424_s25  }
 0x310   :  { %419 = dma.done.wait [#allocation4], 256  }
 0x311   :  { %420 = vsyncadd [#allocation4], 4294967040 }
 0x312   :  { %310 = vsyncpa [#allocation4], 1 }

// kernel: transformer_decoder_layer.16
= control target key start
LH: loop header
LB: loop body
LE: loop exit
PB: predicated region body
PF: predicated region fallthrough
CT: control target
= control target key end

     0   :  { %11 = vsyncpa [#allocation3], 0  ;;  %s1754_s0 = inlined_call_operand.vmem [shape: f32[2,4,8,8], index: 0, kind: input, shape index: {}]   ;;  %s1755_s1 = inlined_call_operand.vmem [shape: f32[2,4,10,8], index: 1, kind: input, shape index: {}]   ;;  %s1756_s2 = inlined_call_operand.vmem [shape: f32[2,4,10,8], index: 2, kind: input, shape index: {}]   ;;  %s1757_s3 = inlined_call_operand.vmem [shape: f32[2,1,10], index: 3, kind: input, shape index: {}]   ;;  %s1758_s4 = inlined_call_operand.vmem [shape: f32[2,4,8,8], index: 4, kind: output, shape index: {0}]   ;;  %s1759_s5 = inlined_call_operand.hbm [shape: f32[2,8,10], index: 5, kind: output, shape index: {1}]  }
   0x1   :  { %13 = vsyncpa [#allocation3 + $0x1], 0  ;;  %s1548_s18 = smov 0   ;;  %s1550_s19 = smov 0  }
   0x2   :  { %s1552_s20 = smov 0   ;;  %s1554_s21 = smov 0  }
   0x3   :  { %s1556_s22 = smov 0   ;;  %s1558_s23 = smov 0  }
   0x4 LB: > { %s1203_s24 = sadd.s32 4294967295, %s1511_s23   ;;  %s1204_s25 = sadd.s32 4294967294, %s1511_s23   ;;  %s1511_s23 = sphi %s1558_s23, %s19_s23   ;;  %s1507_s22 = sphi %s1556_s22, %s1770_s22   ;;  %s1503_s21 = sphi %s1554_s21, %s1769_s21   ;;  %s1499_s20 = sphi %s1552_s20, %s1768_s20   ;;  %s1495_s19 = sphi %s1550_s19, %s1767_s19   ;;  %s1491_s18 = sphi %s1548_s18, %s1766_s18  }
   0x5   : > { %s31_s26 = sadd.s32 1, %s1507_s22  ;;  %s174_s27 = sadd.s32 1, %s1499_s20 }
   0x6   : > { %p33_p0 = scmp.ge.s32.totalorder %s31_s26, 2  ;;  %p184_p1 = scmp.ne.s32.totalorder %s1499_s20, %s1495_s19 }
   0x7   : > { %p185_p2 = scmp.eq.s32.totalorder %s1203_s24, 1  ;;  %p190_p3 = scmp.ne.s32.totalorder %s1495_s19, %s1491_s18 }
   0x8   : > { %s1772_s26 = smov (%p33_p0, %s31_s26), 0  ;;  %p191_p5 = scmp.eq.s32.totalorder %s1204_s25, 1 }
   0x9   : > { %p1588_p4 = por %p185_p2, %p184_p1  ;;  %s169_s29 = ssub.s32 %s1507_s22, %s1772_s26 }
   0xa   : > { %p1207_p6 = scmp.ge.s32.totalorder %s1511_s23, 1  ;;  %p172_p7 = scmp.eq.s32.totalorder %s169_s29, 0 }
   0xb   : > { %p1595_p8 = por %p191_p5, %p190_p3  ;;  %p242_p9 = scmp.lt.s32.totalorder %s1511_s23, 3 }
   0xc   : > { %s1601_s6 = scalar_select %p172_p7, %s1499_s20, %s174_s27  }
   0xd   : > { %p243_p10 = pnand %p1207_p6, %p242_p9 }
   0xe   : > { %p294_p11 = scmp.lt.s32.totalorder (!%p243_p10), %s1503_s21, 1  ;;  %v1513_v0 = vmov (!%p243_p10), 0.0|0.0   ;;  %vm354_vm0 = vcmask (!%p243_p10), 64512   ;;  %vm1514_vm1 = vmmov (!%p243_p10), 0   ;;  %v1515_v1 = vmov (!%p243_p10), 0.0   ;;  %s1517_s25 = smov (!%p243_p10), [#allocation2]  }
   0xf   : > { %246 = sbr.rel (%p243_p10) target bundleno = 789 (0x315), region = 36  ;;  %1326 = vmatprep.subr.bf16.mxu0 (!%p243_p10), %v1513_v0  ;;  %1330 = vmatprep.subr.bf16.mxu1 (!%p243_p10), %v1513_v0  ;;  %vm1622_vm2 = vmpackc.low (!%p243_p10), %vm354_vm0, %vm354_vm0  ;;  %vm671_vm3 = vcmask (!%p243_p10), 80896   ;;  %vm719_vm4 = vcmask (!%p243_p10), 1041408   ;;  %vm1516_vm5 = vmmov (!%p243_p10), 1   ;;  %s1437_s27 = sshll.u32 (!%p243_p10), %s1517_s25, 4  ;;  %s1438_s27 = int_to_ptr.vmem [resolvable:$false] %s1437_s27 }
  0x10   : > { %1274 = vmatprep.mubr.msk.f32.mxu0 (!%p243_p10), %vm1514_vm1, %v1515_v1  ;;  %1281 = vmatprep.mubr.msk.f32.mxu1 (!%p243_p10), %vm1514_vm1, %v1515_v1  ;;  %vm1672_vm6 = vmpackc.low (!%p243_p10), %vm719_vm4, %vm1516_vm5 }
  0x16   : > { %s1607_s7 = scalar_select %p294_p11, %s1503_s21, 1 }
  0x18   : > { %s1243_s8 = sshll.u32 %s1607_s7, 6  ;;  %s1242_s9 = sshll.u32 %s1607_s7, 5 }
  0x19   : > { %s306_s12 = scalar_lea.vmem %s1755_s1, %s1243_s8  ;;  %s301_s15 = scalar_lea.vmem %s1754_s0, %s1242_s9 }
  0x1a   : > { %v331_v3 = vld [vmem:[%s306_s12] sm:$0xff]  ;;  %v332_v4 = vld [vmem:[%s306_s12 + $0x8] sm:$0x3]  ;;  %v333_v5 = vld [vmem:[%s306_s12 + $0x10] sm:$0xff]  ;;  %s314_s24 = scalar_lea.vmem %s1757_s3, %s1607_s7  ;;  %s311_s29 = scalar_lea.vmem %s1756_s2, %s1243_s8 }
  0x1b   : > { %v1327_v6 = vpack.c.bf16 %v332_v4, %v331_v3  ;;  %v334_v7 = vld [vmem:[%s306_s12 + $0x18] sm:$0x3]  ;;  %v323_v9 = vld [vmem:[%s301_s15] sm:$0xff]  ;;  %v336_v11 = vld [vmem:[%s306_s12 + $0x28] sm:$0x3]  ;;  %s291_s8 = sand.u32 1, %s1495_s19  }
  0x1c   : > { %v1331_v8 = vpack.c.bf16 %v334_v7, %v333_v5  ;;  %v335_v10 = vld [vmem:[%s306_s12 + $0x20] sm:$0xff]  ;;  %v324_v12 = vld [vmem:[%s301_s15 + $0x8] sm:$0xff]  ;;  %v337_v13 = vld [vmem:[%s306_s12 + $0x30] sm:$0xff]  ;;  %v327_v15 = vmul.f32 0.35355338, %v323_v9  ;;  %s1208_s10 = sshll.u32 %s291_s8, 3 }
  0x1d   : > { %1329 = vmatpush3.bf16.xpose.msk.msra.mxu0 %vm1622_vm2, %v1327_v6  ;;  %v338_v14 = vld [vmem:[%s306_s12 + $0x38] sm:$0x3]  ;;  %v1335_v16 = vpack.c.bf16 %v336_v11, %v335_v10  ;;  %v328_v17 = vmul.f32 0.35355338, %v324_v12  ;;  %v325_v19 = vld [vmem:[%s301_s15 + $0x10] sm:$0xff]  ;;  %v339_v60 = vld [vmem:[%s311_s29] sm:$0xff] }
  0x1e   : > { %1333 = vmatpush3.bf16.xpose.msk.msra.mxu1 %vm1622_vm2, %v1331_v8  ;;  %1334 = vmatprep.subr.bf16.mxu0 %v1513_v0  ;;  %v1339_v18 = vpack.c.bf16 %v338_v14, %v337_v13  ;;  %v326_v20 = vld [vmem:[%s301_s15 + $0x18] sm:$0xff]  ;;  %v329_v21 = vmul.f32 0.35355338, %v325_v19  ;;  %v1217_v23 = vld [vmem:[%s314_s24] ss:$0 sm:$0xff]  ;;  %v341_v2 = vld [vmem:[%s311_s29 + $0x10] sm:$0xff] }
  0x1f   : > { %1338 = vmatprep.subr.bf16.mxu1 %v1513_v0  ;;  %v330_v22 = vmul.f32 0.35355338, %v326_v20  ;;  %v340_v61 = vld [vmem:[%s311_s29 + $0x8] sm:$0x3]  ;;  %v342_v3 = vld [vmem:[%s311_s29 + $0x18] sm:$0x3] }
  0x20   : > { %v1343_v62 = vpack.c.bf16 %v340_v61, %v339_v60  ;;  %v1347_v4 = vpack.c.bf16 %v342_v3, %v341_v2  ;;  %v343_v8 = vld [vmem:[%s311_s29 + $0x20] sm:$0xff]  ;;  %v344_v9 = vld [vmem:[%s311_s29 + $0x28] sm:$0x3]  ;;  %v345_v14 = vld [vmem:[%s311_s29 + $0x30] sm:$0xff]  ;;  %s293_s11 = scalar_lea.vmem [#allocation2], %s1208_s10  ;;  %s1239_s12 = sshll.u32 %s1503_s21, 7 }
  0x21   : > { %v1351_v11 = vpack.c.bf16 %v344_v9, %v343_v8  ;;  %s1060_s13 = sshll.u32 %s293_s11, 4  ;;  %s1704_s16 = scalar_lea.hbm %s1759_s5, %s1239_s12  ;;  %s1061_s13 = int_to_ptr.vmem [resolvable:$true] %s1060_s13 }
  0x22   : > { %s1043_s17 = scalar_lea.sflag [#allocation3], %s291_s8  ;;  %s1433_s24 = scalar_lea.vmem %s1061_s13, 128 }
  0x23   : > { %p1434_p12 = scmp.ne.s32.totalorder %s1061_s13, %s1433_s24  ;;  %p1440_p1 = scmp.lt.s32.totalorder %s1061_s13, %s1438_s27 }
  0x24   : > { %1275 = vmatmul.mubr.msk.f32.vlgmr.msra.gmra.mrb[0].mxu0 %vm354_vm0, %v327_v15  ;;  %v346_v15 = vld [vmem:[%s311_s29 + $0x38] sm:$0x3]  ;;  %s1439_s29 = scalar_lea.vmem %s1438_s27, 256 }
  0x25   : > { %1337 = vmatpush3.bf16.xpose.msk.msra.mxu0 %vm1622_vm2, %v1335_v16  ;;  %1282 = vmatmul.mubr.msk.f32.vlgmr.msra.gmra.mrb[0].mxu1 %vm354_vm0, %v328_v17  ;;  %p1435_p13 = pnand %p1434_p12, %p1588_p4  ;;  %p1441_p2 = scmp.lt.s32.totalorder %s1439_s29, %s1433_s24 }
  0x26   : > { %1341 = vmatpush3.bf16.xpose.msk.msra.mxu1 %vm1622_vm2, %v1339_v18  ;;  %1288 = vmatprep.mubr.msk.f32.mxu0 %vm1514_vm1, %v1515_v1 }
  0x27   : > { %1295 = vmatprep.mubr.msk.f32.mxu1 %vm1514_vm1, %v1515_v1  ;;  %1342 = vmatprep.subr.bf16.mxu0 %v1513_v0  ;;  %p1436_p0 = pneg %p1435_p13  ;;  %p1442_p3 = por %p1441_p2, %p1440_p1 }
  0x28   : > { %1346 = vmatprep.subr.bf16.mxu1 %v1513_v0 }
  0x29   : > { %p1443_p5 = pnand %p1442_p3, %p1436_p0 }
  0x2c   : > { %1289 = vmatmul.mubr.msk.f32.vlgmr.msra.gmra.mrb[2].mxu0 %vm354_vm0, %v329_v21 }
  0x2d   : > { %1296 = vmatmul.mubr.msk.f32.vlgmr.msra.gmra.mrb[2].mxu1 %vm354_vm0, %v330_v22  ;;  %1302 = vmatprep.mubr.msk.f32.mxu0 %vm1514_vm1, %v1515_v1 }
  0x2e   : > { %1309 = vmatprep.mubr.msk.f32.mxu1 %vm1514_vm1, %v1515_v1  ;;  %1345 = vmatpush3.bf16.msk.msra.mxu0 %vm1672_vm6, %v1343_v62 }
  0x2f   : > { %1350 = vmatprep.subr.bf16.mxu0 %v1513_v0  ;;  %1349 = vmatpush3.bf16.msk.msra.mxu1 %vm1672_vm6, %v1347_v4 }
  0x30   : > { %1354 = vmatprep.subr.bf16.mxu1 %v1513_v0  ;;  %v1355_v0 = vpack.c.bf16 %v346_v15, %v345_v14 }
  0xf7   : > { %v430_v24 = vpop.f32.mrb[0].mxu0 }
  0xf8   : > { %v431_v25 = vadd.f32 %v1217_v23, %v430_v24  ;;  %v1276_v26 = vpop.f32.mrb[1].mxu0  ;;  %v509_v27 = vpop.f32.mrb[0].mxu1 }
  0xf9   : > { %v510_v28 = vadd.f32 %v1217_v23, %v509_v27  ;;  %v1283_v29 = vpop.f32.mrb[1].mxu1 }
  0xfa   : > { %v672_v30 = vsel %vm671_vm3, %v431_v25, -inf }
  0xfb   : > { %673 = vmax.xlane.f32.xlu0 %v672_v30  ;;  %v675_v31 = vsel %vm671_vm3, %v510_v28, -inf }
  0xff   : > { %676 = vmax.xlane.f32.xlu0 %v675_v31  ;;  %v588_v32 = vpop.f32.mrb[2].mxu0 }
 0x100   : > { %v589_v33 = vadd.f32 %v1217_v23, %v588_v32  ;;  %v1290_v34 = vpop.f32.mrb[3].mxu0  ;;  %v667_v35 = vpop.f32.mrb[2].mxu1 }
 0x101   : > { %v668_v36 = vadd.f32 %v1217_v23, %v667_v35  ;;  %v1297_v37 = vpop.f32.mrb[3].mxu1 }
 0x102   : > { %v678_v38 = vsel %vm671_vm3, %v589_v33, -inf }
 0x103   : > { %679 = vmax.xlane.f32.xlu1 %v678_v38  ;;  %v681_v39 = vsel %vm671_vm3, %v668_v36, -inf }
 0x107   : > { %682 = vmax.xlane.f32.xlu1 %v681_v39 }
 0x188   : > { %v674_v40 = vpop.xlane.xlu0 %673 }
 0x189   : > { %v684_v41 = vsub.f32 %v431_v25, %v674_v40 }
 0x18b   : > { %v688_v42 = vmul.f32 1.442695, %v684_v41 }
 0x18c   : > { %v677_v43 = vpop.xlane.xlu0 %676 }
 0x18d   : > { %1417 = vpow2.f32 %v688_v42  ;;  %v685_v44 = vsub.f32 %v510_v28, %v677_v43 }
 0x18f   : > { %v690_v45 = vmul.f32 1.442695, %v685_v44 }
 0x190   : > { %v680_v46 = vpop.xlane.xlu1 %679 }
 0x191   : > { %1419 = vpow2.f32 %v690_v45  ;;  %v686_v47 = vsub.f32 %v589_v33, %v680_v46 }
 0x193   : > { %v692_v48 = vmul.f32 1.442695, %v686_v47 }
 0x194   : > { %v683_v49 = vpop.xlane.xlu1 %682 }
 0x195   : > { %1421 = vpow2.f32 %v692_v48  ;;  %v687_v50 = vsub.f32 %v668_v36, %v683_v49 }
 0x197   : > { %v1418_v51 = vpop.eup %1417  ;;  %v694_v52 = vmul.f32 1.442695, %v687_v50 }
 0x198   : > { %v696_v53 = vsel %vm671_vm3, %v1418_v51, 0.0 }
 0x199   : > { %1423 = vpow2.f32 %v694_v52  ;;  %697 = vadd.xlane.f32.xlu0 %v696_v53 }
 0x19b   : > { %v1420_v54 = vpop.eup %1419 }
 0x19c   : > { %v699_v55 = vsel %vm671_vm3, %v1420_v54, 0.0 }
 0x19d   : > { %700 = vadd.xlane.f32.xlu1 %v699_v55 }
 0x19f   : > { %v1422_v56 = vpop.eup %1421 }
 0x1a0   : > { %v702_v57 = vsel %vm671_vm3, %v1422_v56, 0.0 }
 0x1a1   : > { %703 = vadd.xlane.f32.xlu0 %v702_v57 }
 0x1a3   : > { %v1424_v58 = vpop.eup %1423 }
 0x1a4   : > { %v705_v59 = vsel %vm671_vm3, %v1424_v58, 0.0 }
 0x1a5   : > { %706 = vadd.xlane.f32.xlu1 %v705_v59 }
 0x226   : > { %v698_v5 = vpop.xlane.xlu0 %697 }
 0x227   : > { %1425 = vrcp.f32 %v698_v5 }
 0x22a   : > { %v701_v6 = vpop.xlane.xlu1 %700 }
 0x22b   : > { %1427 = vrcp.f32 %v701_v6 }
 0x22e   : > { %v704_v7 = vpop.xlane.xlu0 %703 }
 0x22f   : > { %1429 = vrcp.f32 %v704_v7 }
 0x231   : > { %v1426_v10 = vpop.eup %1425 }
 0x232   : > { %v712_v12 = vmul.f32 %v1426_v10, %v1418_v51  ;;  %v707_v13 = vpop.xlane.xlu1 %706 }
 0x233   : > { %1431 = vrcp.f32 %v707_v13 }
 0x234   : > { %1303 = vmatmul.mubr.msk.f32.vlgmr.msra.gmra.mrb[4].mxu0 %vm671_vm3, %v712_v12  ;;  %v1025_v21 = vsel %vm671_vm3, %v712_v12, 0.0 }
 0x235   : > { %v1428_v16 = vpop.eup %1427  ;;  %1353 = vmatpush3.bf16.msk.msra.mxu0 %vm1672_vm6, %v1351_v11  ;;  %1316 = vmatprep.mubr.msk.f32.mxu0 %vm1514_vm1, %v1515_v1 }
 0x236   : > { %v713_v17 = vmul.f32 %v1428_v16, %v1420_v54 }
 0x238   : > { %1310 = vmatmul.mubr.msk.f32.vlgmr.msra.gmra.mrb[4].mxu1 %vm671_vm3, %v713_v17  ;;  %v1026_v20 = vsel %vm671_vm3, %v713_v17, 0.0 }
 0x239   : > { %v1430_v18 = vpop.eup %1429  ;;  %1357 = vmatpush3.bf16.msk.msra.mxu1 %vm1672_vm6, %v1355_v0  ;;  %1323 = vmatprep.mubr.msk.f32.mxu1 %vm1514_vm1, %v1515_v1  ;;  %v1027_v24 = vadd.f32 %v1026_v20, %v1025_v21 }
 0x23a   : > { %v714_v19 = vmul.f32 %v1430_v18, %v1422_v56 }
 0x23c   : > { %1317 = vmatmul.mubr.msk.f32.vlgmr.msra.gmra.mrb[6].mxu0 %vm671_vm3, %v714_v19  ;;  %v1028_v22 = vsel %vm671_vm3, %v714_v19, 0.0 }
 0x23d   : > { %v1432_v23 = vpop.eup %1431  ;;  %v1029_v26 = vadd.f32 %v1028_v22, %v1027_v24 }
 0x23e   : > { %v715_v25 = vmul.f32 %v1432_v23, %v1424_v58 }
 0x240   : > { %1324 = vmatmul.mubr.msk.f32.vlgmr.msra.gmra.mrb[6].mxu1 %vm671_vm3, %v715_v25  ;;  %v1030_v1 = vsel %vm671_vm3, %v715_v25, 0.0 }
 0x241   : > { %v1031_v27 = vadd.f32 %v1030_v1, %v1029_v26 }
 0x243   : > { %v1032_v28 = vmul.f32 0.25, %v1031_v27 }
 0x245   : > { %1033 = vst.msk [vmem:[%s293_s11] sm:$0xff] %vm671_vm3, %v1032_v28 }
 0x246   : > { %1446 = shalt.err (!%p1443_p5)
}
 0x247   : > { %s1447_s21 = scalar_lea.hbm %s1704_s16, 128  ;;  %s1451_s11 = scalar_lea.hbm %s1759_s5, 256 }
 0x248   : > { %p1448_p6 = scmp.ne.s32.totalorder %s1704_s16, %s1447_s21  ;;  %p1452_p10 = scmp.lt.u32.totalorder %s1704_s16, %s1759_s5 }
 0x249   : > { %p1453_p11 = scmp.lt.u32.totalorder %s1451_s11, %s1447_s21  ;;  %p1455_p13 = scmp.lt.u32.totalorder %s1447_s21, %s1704_s16 }
 0x24a   : > { %p1449_p7 = pnand %p1448_p6, %p1588_p4 }
 0x24b   : > { %p1454_p12 = por %p1453_p11, %p1452_p10 }
 0x24c   : > { %p1450_p9 = pneg %p1449_p7 }
 0x24d   : > { %p1456_p0 = por %p1455_p13, %p1454_p12 }
 0x24f   : > { %p1457_p1 = pnand %p1456_p0, %p1450_p9 }
 0x251   : > { %1460 = shalt.err (!%p1457_p1)
}
 0x252   : > { %1358 = dma.vmem_to_hbm [thread:$0]  (%p1588_p4), %s1061_s13, 128, %s1704_s16, %s1043_s17  }
 0x253   : > { %s322_s25 = scalar_lea.vmem %s1758_s4, %s1242_s9 }
 0x307   : > { %v789_v29 = vpop.f32.mrb[4].mxu0 }
 0x308   : > { %1021 = vst.msk [vmem:[%s322_s25] sm:$0xff] %vm354_vm0, %v789_v29  ;;  %v1304_v30 = vpop.f32.mrb[5].mxu0 }
 0x30b   : > { %v865_v31 = vpop.f32.mrb[4].mxu1 }
 0x30c   : > { %1022 = vst.msk [vmem:[%s322_s25 + $0x8] sm:$0xff] %vm354_vm0, %v865_v31  ;;  %v1311_v32 = vpop.f32.mrb[5].mxu1 }
 0x30f   : > { %v941_v33 = vpop.f32.mrb[6].mxu0 }
 0x310   : > { %1023 = vst.msk [vmem:[%s322_s25 + $0x10] sm:$0xff] %vm354_vm0, %v941_v33  ;;  %v1318_v34 = vpop.f32.mrb[7].mxu0 }
 0x313   : > { %v1017_v35 = vpop.f32.mrb[6].mxu1 }
 0x314   : > { %1024 = vst.msk [vmem:[%s322_s25 + $0x18] sm:$0xff] %vm354_vm0, %v1017_v35  ;;  %v1325_v36 = vpop.f32.mrb[7].mxu1 }
 0x315 PF: > { %p1364_p4 = scmp.ge.s32.totalorder %s1511_s23, 2  ;;  %s1083_s28 = sand.u32 1, %s1491_s18  }
 0x316   : > { %s1084_s7 = scalar_lea.sflag [#allocation3], %s1083_s28 }
 0x317   : > { %p1361_p2 = pnand %p1364_p4, %p1595_p8 }
 0x319   : > { %1486 = dma.done.wait (!%p1361_p2), %s1084_s7, 128  }
 0x31a   : > { %1488 = vsyncadd (!%p1361_p2), %s1084_s7, 4294967168  ;;  %s19_s23 = sadd.s32 1, %s1511_s23   ;;  %s1766_s18 = smov %s1495_s19 }
 0x31b   : > { %p16_p3 = scmp.ge.s32.totalorder %s19_s23, 4   ;;  %s1767_s19 = smov %s1499_s20 }
 0x31c   : > { %s1768_s20 = smov %s1601_s6  ;;  %s1769_s21 = smov %s1507_s22 }
 0x31d   : > { %s1770_s22 = smov %s1772_s26  ;;  %18 = sbr.rel (!%p16_p3) target bundleno = 4 (0x4), region = 92 }
 0x324   :  { %1089 = vsyncpa [#allocation3], 1 }
 0x325   :  { %1091 = vsyncpa [#allocation3 + $0x1], 1 }

</bundles_post_ra>
